<compile_context>
chip_gen: v7x
topology: tpu7x:2x2x1
jax: 0.10.0
libtpu: 0.0.40
codegen_flags: <defaults>
</compile_context>

<pallas_src>
import jax
import jax.numpy as jnp
from jax.experimental import pallas as pl
from jax.experimental.pallas import tpu as pltpu

# ------------------------- small, module-consistent sizes -------------------------
B, C, T = 2, 4, 8            # batch, obs channels, time steps
E = 16                       # encoder embedding dim
H1, H2 = 512, 256            # hidden_sizes = (512, 256)  (fixed by Us_1 / Us_2)
IN_FLAT = C * T              # flattened obs dim fed to the student MLP
TE = T * E                   # teacher input dim (concat of per-step embeddings)
TC = T * C                   # time-major flattened obs dim fed to fused encoder


def _student_kernel(xtc_ref, obsf_ref,
                    weblk_ref, beblk_ref,
                    wt0_ref, bt0_ref, wt1us1_ref, bt1_ref, wt2_ref, bt2_ref,
                    ws1_ref, bs1_ref, ws2_ref, bs2_ref,
                    us2_ref,
                    ps_ref,
                    logits_ref):
    f32 = jnp.float32
    bf16 = jnp.bfloat16

    # ---- fused encoder: one lane-dense matmul against the block-diagonal We ----
    # h_all[:, t*E:(t+1)*E] == ReLU(obs[:, :, t] @ We + be)
    h_all = jnp.dot(xtc_ref[...], weblk_ref[...], preferred_element_type=f32)
    h_all = jnp.maximum(h_all + beblk_ref[...], 0.0)           # (BB, T*E)

    ps00 = ps_ref[0]   # clamp(ps00, 0, 1)
    ps01 = ps_ref[1]   # clamp(1 - ps00, 0, 1)
    ps10 = ps_ref[2]   # clamp(ps10, 0, 1)
    ps11 = ps_ref[3]   # clamp(1 - ps10, 0, 1)

    # ---- teacher MLP (old_policy.actor); zs = [t0, t2] ----
    # Native bf16 x bf16 MXU matmuls with f32 accumulation (no weight upcast).
    t0 = jnp.maximum(
        jnp.dot(h_all.astype(bf16), wt0_ref[...], preferred_element_type=f32)
        + bt0_ref[...], 0.0)                                   # (BB, H1)

    # One fused MXU pass for both consumers of t0: [Wt1 | Us_1] -> (BB, 2*H1)
    tmp = jnp.dot(t0.astype(bf16), wt1us1_ref[...], preferred_element_type=f32)
    t1 = jnp.maximum(tmp[:, :H1] + bt1_ref[...], 0.0)          # teacher hidden 1
    u1 = tmp[:, H1:]                                           # t0 @ Us_1 (unscaled)

    t2 = jnp.maximum(
        jnp.dot(t1.astype(bf16), wt2_ref[...], preferred_element_type=f32)
        + bt2_ref[...], 0.0)                                   # (BB, H2)

    # ---- student layer 0 + teacher knowledge transfer, then ReLU ----
    s1 = jnp.dot(obsf_ref[...].astype(bf16), ws1_ref[...],
                 preferred_element_type=f32) + bs1_ref[...]
    o = ps01 * u1 + ps00 * s1          # (ps01*t0) @ Us_1 == ps01 * (t0 @ Us_1)
    o = jnp.maximum(o, 0.0)

    # ---- student layer 1 + teacher knowledge transfer, then ReLU ----
    s2 = jnp.dot(o.astype(bf16), ws2_ref[...],
                 preferred_element_type=f32) + bs2_ref[...]
    u2 = jnp.dot(t2.astype(bf16), us2_ref[...], preferred_element_type=f32)
    o = jnp.maximum(ps11 * u2 + ps10 * s2, 0.0)

    logits_ref[...] = o


def _round_up(x, m):
    return ((x + m - 1) // m) * m


def pack_params(params):
    """One-time packing of kernel-ready operands (hoisted out of the per-call path)."""
    Cx, Ex = params["We"].shape
    Tx = params["Wt0"].shape[0] // Ex

    # block-diagonal encoder weight: one (T*C, T*E) matmul == T per-timestep matmuls
    eye_t = jnp.eye(Tx, dtype=jnp.float32)
    we_blk = (eye_t[:, None, :, None]
              * params["We"][None, :, None, :]).reshape(Tx * Cx, Tx * Ex)
    be_blk = jnp.tile(params["be"], (1, Tx))                   # (1, T*E)

    ps00 = jnp.clip(params["ps00"], 0.0, 1.0)
    ps01 = jnp.clip(1.0 - params["ps00"], 0.0, 1.0)
    ps10 = jnp.clip(params["ps10"], 0.0, 1.0)
    ps11 = jnp.clip(1.0 - params["ps10"], 0.0, 1.0)
    ps_vec = jnp.concatenate([ps00, ps01, ps10, ps11]).astype(jnp.float32)  # (4,)

    # fuse the two matmuls that share LHS t0: [Wt1 | Us_1] -> (H1, 2*H1), bf16
    wt1us1 = jnp.concatenate([params["Wt1"], params["Us1"]], axis=1)

    return {
        "We": params["We"], "be": params["be"],
        "we_blk": we_blk, "be_blk": be_blk,
        "Wt0": params["Wt0"], "bt0": params["bt0"],
        "Wt1Us1": wt1us1, "bt1": params["bt1"],
        "Wt2": params["Wt2"], "bt2": params["bt2"],
        "Ws1": params["Ws1"], "bs1": params["bs1"],
        "Ws2": params["Ws2"], "bs2": params["bs2"],
        "Us2": params["Us2"],
        "ps_vec": ps_vec,
        "student_ps": (ps00 + ps10) / 2.0,                     # (1,)
    }


def student_net_forward(packed, obs, state=None, act=None):
    """Returns (logits, state, student_ps, embedding) like student_Net.forward."""
    assert act is None  # TODO(synk): concat/critic path (act is not None) not implemented
    Bx, Cx, Tx = obs.shape
    Ex = packed["We"].shape[1]
    obs = obs.astype(jnp.float32)

    # time-major flatten for the fused (block-diagonal) encoder matmul
    x_tc = jnp.transpose(obs, (0, 2, 1)).reshape(Bx, Tx * Cx)      # (B, T*C)
    # PyTorch .flatten(1) layout for the student MLP input
    obs_flat = obs.reshape(Bx, Cx * Tx)                            # (B, C*T)

    # last-timestep embedding: tiny pure-JAX matmul (h_all output removed from kernel)
    embedding = jnp.maximum(obs[:, :, Tx - 1] @ packed["We"] + packed["be"], 0.0)

    # ---- batch tiling: >=2 grid steps whenever Bx > 8 so v7x megacore can shard ----
    if Bx > 8:
        BB = min(128, _round_up(pl.cdiv(Bx, 2), 8))
    else:
        BB = Bx
    grid = (pl.cdiv(Bx, BB),)

    def rep(p):       # replicated (weight) operand: same block every grid step
        return pl.BlockSpec(p.shape, lambda b: (0,) * p.ndim)

    def bat(ncols):   # batch-blocked operand
        return pl.BlockSpec((BB, ncols), lambda b: (b, 0))

    inputs = (x_tc, obs_flat, packed["we_blk"], packed["be_blk"],
              packed["Wt0"], packed["bt0"], packed["Wt1Us1"], packed["bt1"],
              packed["Wt2"], packed["bt2"],
              packed["Ws1"], packed["bs1"], packed["Ws2"], packed["bs2"],
              packed["Us2"],
              packed["ps_vec"])

    in_specs = [
        bat(Tx * Cx),                 # x_tc
        bat(Cx * Tx),                 # obs_flat
        rep(packed["we_blk"]), rep(packed["be_blk"]),
        rep(packed["Wt0"]), rep(packed["bt0"]),
        rep(packed["Wt1Us1"]), rep(packed["bt1"]),
        rep(packed["Wt2"]), rep(packed["bt2"]),
        rep(packed["Ws1"]), rep(packed["bs1"]),
        rep(packed["Ws2"]), rep(packed["bs2"]),
        rep(packed["Us2"]),
        pl.BlockSpec(memory_space=pltpu.MemorySpace.SMEM),        # ps_vec (scalars)
    ]
    out_specs = bat(H2)

    # advisory cost estimate: the kernel is dominated by the bf16 weight loads
    flops = 2 * Bx * (Tx * Cx * Tx * Ex          # fused block-diagonal encoder
                      + Tx * Ex * H1             # Wt0
                      + H1 * 2 * H1              # fused [Wt1 | Us_1]
                      + H1 * H2                  # Wt2
                      + Cx * Tx * H1             # Ws1
                      + H1 * H2                  # Ws2
                      + H2 * H2)                 # Us_2
    in_bytes = sum(int(a.size) * a.dtype.itemsize for a in inputs)
    out_bytes = Bx * H2 * 4
    cost = pl.CostEstimate(flops=int(flops), transcendentals=0,
                           bytes_accessed=int(in_bytes + out_bytes))

    logits = pl.pallas_call(
        _student_kernel,
        grid=grid,
        out_shape=jax.ShapeDtypeStruct((Bx, H2), jnp.float32),
        in_specs=in_specs,
        out_specs=out_specs,
        compiler_params=pltpu.CompilerParams(dimension_semantics=("parallel",)),
        cost_estimate=cost,
    )(*inputs)

    return logits, state, packed["student_ps"], embedding


# ------------------------- deterministic parameter init -------------------------
def init_params(key):
    ks = jax.random.split(key, 16)
    bf16 = jnp.bfloat16

    def linear_w(k, fan_in, fan_out, dtype=jnp.float32):
        s = 1.0 / jnp.sqrt(jnp.float32(fan_in))
        return jax.random.uniform(k, (fan_in, fan_out), jnp.float32, -s, s).astype(dtype)

    def linear_b(k, fan_in, fan_out):
        s = 1.0 / jnp.sqrt(jnp.float32(fan_in))
        return jax.random.uniform(k, (1, fan_out), jnp.float32, -s, s)

    def xavier(k, n, m, dtype=jnp.float32):
        s = jnp.sqrt(6.0 / (n + m))
        return jax.random.uniform(k, (n, m), jnp.float32, -s, s).astype(dtype)

    return {
        # encoder Linear(C, E)  (tiny; kept f32)
        "We": linear_w(ks[0], C, E), "be": linear_b(ks[1], C, E),
        # teacher (actor) MLP — large weights stored bf16 in HBM
        "Wt0": linear_w(ks[2], TE, H1, bf16), "bt0": linear_b(ks[3], TE, H1),
        "Wt1": linear_w(ks[4], H1, H1, bf16), "bt1": linear_b(ks[5], H1, H1),
        "Wt2": linear_w(ks[6], H1, H2, bf16), "bt2": linear_b(ks[7], H1, H2),
        # student MLP
        "Ws1": linear_w(ks[8], IN_FLAT, H1, bf16), "bs1": linear_b(ks[9], IN_FLAT, H1),
        "Ws2": linear_w(ks[10], H1, H2, bf16), "bs2": linear_b(ks[11], H1, H2),
        # knowledge-transfer matrices (xavier_uniform as in the module)
        "Us1": xavier(ks[12], H1, H1, bf16),
        "Us2": xavier(ks[13], H2, H2, bf16),
        # mixing coefficients
        "ps00": jnp.array([0.4725], jnp.float32),
        "ps10": jnp.array([0.4725], jnp.float32),
    }


# ------------------------- pure-JAX reference (for a sanity check) -------------------------
def reference_forward(params, obs, state=None):
    f32 = jnp.float32
    W = lambda n: params[n].astype(f32)
    h = obs.astype(f32)
    obs_flat = h.reshape(h.shape[0], -1)
    embs = [jnp.maximum(h[:, :, i] @ params["We"] + params["be"], 0.0)
            for i in range(h.shape[2])]
    h_all = jnp.concatenate(embs, axis=1)
    embedding = embs[-1]

    t0 = jnp.maximum(h_all @ W("Wt0") + params["bt0"], 0.0)
    t1 = jnp.maximum(t0 @ W("Wt1") + params["bt1"], 0.0)
    t2 = jnp.maximum(t1 @ W("Wt2") + params["bt2"], 0.0)

    ps00 = jnp.clip(params["ps00"], 0.0, 1.0)
    ps01 = jnp.clip(1.0 - params["ps00"], 0.0, 1.0)
    ps10 = jnp.clip(params["ps10"], 0.0, 1.0)
    ps11 = jnp.clip(1.0 - params["ps10"], 0.0, 1.0)

    s1 = obs_flat @ W("Ws1") + params["bs1"]
    o = (ps01 * t0) @ W("Us1") + ps00 * s1
    o = jnp.maximum(o, 0.0)
    s2 = o @ W("Ws2") + params["bs2"]
    o = (ps11 * t2) @ W("Us2") + ps10 * s2
    o = jnp.maximum(o, 0.0)

    student_ps = (ps00 + ps10) / 2.0
    return o, state, student_ps, embedding


if __name__ == "__main__":
    key = jax.random.PRNGKey(0)
    pkey, okey = jax.random.split(key)
    params = init_params(pkey)
    packed = pack_params(params)          # one-time packing (block-diag We, Wt1|Us1, ps)
    obs = jax.random.normal(okey, (B, C, T), jnp.float32)   # PyTorch layout (B, C, T)

    logits, state, student_ps, embedding = student_net_forward(packed, obs, state=None, act=None)
    jax.block_until_ready((logits, student_ps, embedding))

    assert logits.shape == (B, H2)
    assert embedding.shape == (B, E)
    assert student_ps.shape == (1,)
    assert state is None

    ref_logits, _, ref_ps, ref_emb = reference_forward(params, obs)
    assert jnp.allclose(logits, ref_logits, rtol=1e-2, atol=1e-2)
    assert jnp.allclose(embedding, ref_emb, rtol=1e-2, atol=1e-2)
    assert jnp.allclose(student_ps, ref_ps, rtol=1e-5, atol=1e-5)

    print("KERNEL_OK")
</pallas_src>

<mosaic_0001>
module attributes {stable_mosaic.version = 11 : i64} {
  func.func @_student_kernel(%arg0: i32, %arg1: memref<2x32xf32, #tpu.memory_space<vmem>>, %arg2: memref<2x32xf32, #tpu.memory_space<vmem>>, %arg3: memref<32x128xf32, #tpu.memory_space<vmem>>, %arg4: memref<1x128xf32, #tpu.memory_space<vmem>>, %arg5: memref<128x512xbf16, #tpu.memory_space<vmem>>, %arg6: memref<1x512xf32, #tpu.memory_space<vmem>>, %arg7: memref<512x1024xbf16, #tpu.memory_space<vmem>>, %arg8: memref<1x512xf32, #tpu.memory_space<vmem>>, %arg9: memref<512x256xbf16, #tpu.memory_space<vmem>>, %arg10: memref<1x256xf32, #tpu.memory_space<vmem>>, %arg11: memref<32x512xbf16, #tpu.memory_space<vmem>>, %arg12: memref<1x512xf32, #tpu.memory_space<vmem>>, %arg13: memref<512x256xbf16, #tpu.memory_space<vmem>>, %arg14: memref<1x256xf32, #tpu.memory_space<vmem>>, %arg15: memref<256x256xbf16, #tpu.memory_space<vmem>>, %arg16: memref<4xf32, #tpu.memory_space<smem>>, %arg17: memref<2x256xf32, #tpu.memory_space<vmem>>) attributes {dimension_semantics = [#tpu.dimension_semantics<parallel>], iteration_bounds = array<i64: 1>, scalar_prefetch = 0 : i64, scratch_operands = 0 : i64, tpu.core_type = #tpu.core_type<tc>, window_params = [{transform_indices = @transform_0, window_bounds = array<i64: 2, 32>}, {transform_indices = @transform_1, window_bounds = array<i64: 2, 32>}, {pipeline_mode = #tpu.pipeline_mode<synchronous>, transform_indices = @transform_2, window_bounds = array<i64: 32, 128>}, {pipeline_mode = #tpu.pipeline_mode<synchronous>, transform_indices = @transform_3, window_bounds = array<i64: 1, 128>}, {pipeline_mode = #tpu.pipeline_mode<synchronous>, transform_indices = @transform_4, window_bounds = array<i64: 128, 512>}, {pipeline_mode = #tpu.pipeline_mode<synchronous>, transform_indices = @transform_5, window_bounds = array<i64: 1, 512>}, {pipeline_mode = #tpu.pipeline_mode<synchronous>, transform_indices = @transform_6, window_bounds = array<i64: 512, 1024>}, {pipeline_mode = #tpu.pipeline_mode<synchronous>, transform_indices = @transform_7, window_bounds = array<i64: 1, 512>}, {pipeline_mode = #tpu.pipeline_mode<synchronous>, transform_indices = @transform_8, window_bounds = array<i64: 512, 256>}, {pipeline_mode = #tpu.pipeline_mode<synchronous>, transform_indices = @transform_9, window_bounds = array<i64: 1, 256>}, {pipeline_mode = #tpu.pipeline_mode<synchronous>, transform_indices = @transform_10, window_bounds = array<i64: 32, 512>}, {pipeline_mode = #tpu.pipeline_mode<synchronous>, transform_indices = @transform_11, window_bounds = array<i64: 1, 512>}, {pipeline_mode = #tpu.pipeline_mode<synchronous>, transform_indices = @transform_12, window_bounds = array<i64: 512, 256>}, {pipeline_mode = #tpu.pipeline_mode<synchronous>, transform_indices = @transform_13, window_bounds = array<i64: 1, 256>}, {pipeline_mode = #tpu.pipeline_mode<synchronous>, transform_indices = @transform_14, window_bounds = array<i64: 256, 256>}, {transform_indices = @transform_15, window_bounds = array<i64: 4>}, {transform_indices = @transform_16, window_bounds = array<i64: 2, 256>}]} {
    %c0 = arith.constant 0 : index
    %c0_0 = arith.constant 0 : index
    %0 = vector.load %arg1[%c0, %c0_0] : memref<2x32xf32, #tpu.memory_space<vmem>>, vector<2x32xf32>
    %c0_1 = arith.constant 0 : index
    %c0_2 = arith.constant 0 : index
    %1 = vector.load %arg3[%c0_1, %c0_2] : memref<32x128xf32, #tpu.memory_space<vmem>>, vector<32x128xf32>
    %cst = arith.constant dense<0.000000e+00> : vector<2x128xf32>
    %2 = tpu.matmul %0, %1, %cst {dimension_numbers = #tpu.dot_dimension_numbers<[1], [0], [0], [1], [0, 0, 1, 1], [], []>} : vector<2x32xf32>, vector<32x128xf32>, vector<2x128xf32> -> vector<2x128xf32>
    %c0_3 = arith.constant 0 : index
    %c0_4 = arith.constant 0 : index
    %3 = vector.load %arg4[%c0_3, %c0_4] : memref<1x128xf32, #tpu.memory_space<vmem>>, vector<1x128xf32>
    %4 = vector.broadcast %3 : vector<1x128xf32> to vector<2x128xf32>
    %5 = arith.addf %2, %4 : vector<2x128xf32>
    %cst_5 = arith.constant 0.000000e+00 : f32
    %6 = vector.broadcast %cst_5 : f32 to vector<2x128xf32>
    %7 = arith.maximumf %5, %6 : vector<2x128xf32>
    %c0_6 = arith.constant 0 : index
    %8 = memref.load %arg16[%c0_6] : memref<4xf32, #tpu.memory_space<smem>>
    %c1 = arith.constant 1 : index
    %9 = memref.load %arg16[%c1] : memref<4xf32, #tpu.memory_space<smem>>
    %c2 = arith.constant 2 : index
    %10 = memref.load %arg16[%c2] : memref<4xf32, #tpu.memory_space<smem>>
    %c3 = arith.constant 3 : index
    %11 = memref.load %arg16[%c3] : memref<4xf32, #tpu.memory_space<smem>>
    %12 = arith.truncf %7 : vector<2x128xf32> to vector<2x128xbf16>
    %c0_7 = arith.constant 0 : index
    %c0_8 = arith.constant 0 : index
    %13 = vector.load %arg5[%c0_7, %c0_8] : memref<128x512xbf16, #tpu.memory_space<vmem>>, vector<128x512xbf16>
    %cst_9 = arith.constant dense<0.000000e+00> : vector<2x512xf32>
    %14 = tpu.matmul %12, %13, %cst_9 {dimension_numbers = #tpu.dot_dimension_numbers<[1], [0], [0], [1], [0, 0, 1, 1], [], []>} : vector<2x128xbf16>, vector<128x512xbf16>, vector<2x512xf32> -> vector<2x512xf32>
    %c0_10 = arith.constant 0 : index
    %c0_11 = arith.constant 0 : index
    %15 = vector.load %arg6[%c0_10, %c0_11] : memref<1x512xf32, #tpu.memory_space<vmem>>, vector<1x512xf32>
    %16 = vector.broadcast %15 : vector<1x512xf32> to vector<2x512xf32>
    %17 = arith.addf %14, %16 : vector<2x512xf32>
    %cst_12 = arith.constant 0.000000e+00 : f32
    %18 = vector.broadcast %cst_12 : f32 to vector<2x512xf32>
    %19 = arith.maximumf %17, %18 : vector<2x512xf32>
    %20 = arith.truncf %19 : vector<2x512xf32> to vector<2x512xbf16>
    %c0_13 = arith.constant 0 : index
    %c0_14 = arith.constant 0 : index
    %21 = vector.load %arg7[%c0_13, %c0_14] : memref<512x1024xbf16, #tpu.memory_space<vmem>>, vector<512x1024xbf16>
    %cst_15 = arith.constant dense<0.000000e+00> : vector<2x1024xf32>
    %22 = tpu.matmul %20, %21, %cst_15 {dimension_numbers = #tpu.dot_dimension_numbers<[1], [0], [0], [1], [0, 0, 1, 1], [], []>} : vector<2x512xbf16>, vector<512x1024xbf16>, vector<2x1024xf32> -> vector<2x1024xf32>
    %23 = vector.extract_strided_slice %22 {offsets = [0, 0], sizes = [2, 512], strides = [1, 1]} : vector<2x1024xf32> to vector<2x512xf32>
    %c0_16 = arith.constant 0 : index
    %c0_17 = arith.constant 0 : index
    %24 = vector.load %arg8[%c0_16, %c0_17] : memref<1x512xf32, #tpu.memory_space<vmem>>, vector<1x512xf32>
    %25 = vector.broadcast %24 : vector<1x512xf32> to vector<2x512xf32>
    %26 = arith.addf %23, %25 : vector<2x512xf32>
    %cst_18 = arith.constant 0.000000e+00 : f32
    %27 = vector.broadcast %cst_18 : f32 to vector<2x512xf32>
    %28 = arith.maximumf %26, %27 : vector<2x512xf32>
    %29 = vector.extract_strided_slice %22 {offsets = [0, 512], sizes = [2, 512], strides = [1, 1]} : vector<2x1024xf32> to vector<2x512xf32>
    %30 = arith.truncf %28 : vector<2x512xf32> to vector<2x512xbf16>
    %c0_19 = arith.constant 0 : index
    %c0_20 = arith.constant 0 : index
    %31 = vector.load %arg9[%c0_19, %c0_20] : memref<512x256xbf16, #tpu.memory_space<vmem>>, vector<512x256xbf16>
    %cst_21 = arith.constant dense<0.000000e+00> : vector<2x256xf32>
    %32 = tpu.matmul %30, %31, %cst_21 {dimension_numbers = #tpu.dot_dimension_numbers<[1], [0], [0], [1], [0, 0, 1, 1], [], []>} : vector<2x512xbf16>, vector<512x256xbf16>, vector<2x256xf32> -> vector<2x256xf32>
    %c0_22 = arith.constant 0 : index
    %c0_23 = arith.constant 0 : index
    %33 = vector.load %arg10[%c0_22, %c0_23] : memref<1x256xf32, #tpu.memory_space<vmem>>, vector<1x256xf32>
    %34 = vector.broadcast %33 : vector<1x256xf32> to vector<2x256xf32>
    %35 = arith.addf %32, %34 : vector<2x256xf32>
    %cst_24 = arith.constant 0.000000e+00 : f32
    %36 = vector.broadcast %cst_24 : f32 to vector<2x256xf32>
    %37 = arith.maximumf %35, %36 : vector<2x256xf32>
    %c0_25 = arith.constant 0 : index
    %c0_26 = arith.constant 0 : index
    %38 = vector.load %arg2[%c0_25, %c0_26] : memref<2x32xf32, #tpu.memory_space<vmem>>, vector<2x32xf32>
    %39 = arith.truncf %38 : vector<2x32xf32> to vector<2x32xbf16>
    %c0_27 = arith.constant 0 : index
    %c0_28 = arith.constant 0 : index
    %40 = vector.load %arg11[%c0_27, %c0_28] : memref<32x512xbf16, #tpu.memory_space<vmem>>, vector<32x512xbf16>
    %cst_29 = arith.constant dense<0.000000e+00> : vector<2x512xf32>
    %41 = tpu.matmul %39, %40, %cst_29 {dimension_numbers = #tpu.dot_dimension_numbers<[1], [0], [0], [1], [0, 0, 1, 1], [], []>} : vector<2x32xbf16>, vector<32x512xbf16>, vector<2x512xf32> -> vector<2x512xf32>
    %c0_30 = arith.constant 0 : index
    %c0_31 = arith.constant 0 : index
    %42 = vector.load %arg12[%c0_30, %c0_31] : memref<1x512xf32, #tpu.memory_space<vmem>>, vector<1x512xf32>
    %43 = vector.broadcast %42 : vector<1x512xf32> to vector<2x512xf32>
    %44 = arith.addf %41, %43 : vector<2x512xf32>
    %45 = vector.broadcast %9 : f32 to vector<2x512xf32>
    %46 = arith.mulf %45, %29 : vector<2x512xf32>
    %47 = vector.broadcast %8 : f32 to vector<2x512xf32>
    %48 = arith.mulf %47, %44 : vector<2x512xf32>
    %49 = arith.addf %46, %48 : vector<2x512xf32>
    %cst_32 = arith.constant 0.000000e+00 : f32
    %50 = vector.broadcast %cst_32 : f32 to vector<2x512xf32>
    %51 = arith.maximumf %49, %50 : vector<2x512xf32>
    %52 = arith.truncf %51 : vector<2x512xf32> to vector<2x512xbf16>
    %c0_33 = arith.constant 0 : index
    %c0_34 = arith.constant 0 : index
    %53 = vector.load %arg13[%c0_33, %c0_34] : memref<512x256xbf16, #tpu.memory_space<vmem>>, vector<512x256xbf16>
    %cst_35 = arith.constant dense<0.000000e+00> : vector<2x256xf32>
    %54 = tpu.matmul %52, %53, %cst_35 {dimension_numbers = #tpu.dot_dimension_numbers<[1], [0], [0], [1], [0, 0, 1, 1], [], []>} : vector<2x512xbf16>, vector<512x256xbf16>, vector<2x256xf32> -> vector<2x256xf32>
    %c0_36 = arith.constant 0 : index
    %c0_37 = arith.constant 0 : index
    %55 = vector.load %arg14[%c0_36, %c0_37] : memref<1x256xf32, #tpu.memory_space<vmem>>, vector<1x256xf32>
    %56 = vector.broadcast %55 : vector<1x256xf32> to vector<2x256xf32>
    %57 = arith.addf %54, %56 : vector<2x256xf32>
    %58 = arith.truncf %37 : vector<2x256xf32> to vector<2x256xbf16>
    %c0_38 = arith.constant 0 : index
    %c0_39 = arith.constant 0 : index
    %59 = vector.load %arg15[%c0_38, %c0_39] : memref<256x256xbf16, #tpu.memory_space<vmem>>, vector<256x256xbf16>
    %cst_40 = arith.constant dense<0.000000e+00> : vector<2x256xf32>
    %60 = tpu.matmul %58, %59, %cst_40 {dimension_numbers = #tpu.dot_dimension_numbers<[1], [0], [0], [1], [0, 0, 1, 1], [], []>} : vector<2x256xbf16>, vector<256x256xbf16>, vector<2x256xf32> -> vector<2x256xf32>
    %61 = vector.broadcast %11 : f32 to vector<2x256xf32>
    %62 = arith.mulf %61, %60 : vector<2x256xf32>
    %63 = vector.broadcast %10 : f32 to vector<2x256xf32>
    %64 = arith.mulf %63, %57 : vector<2x256xf32>
    %65 = arith.addf %62, %64 : vector<2x256xf32>
    %cst_41 = arith.constant 0.000000e+00 : f32
    %66 = vector.broadcast %cst_41 : f32 to vector<2x256xf32>
    %67 = arith.maximumf %65, %66 : vector<2x256xf32>
    %c0_42 = arith.constant 0 : index
    %c0_43 = arith.constant 0 : index
    %68 = vector.load %arg17[%c0_42, %c0_43] : memref<2x256xf32, #tpu.memory_space<vmem>>, vector<2x256xf32>
    tpu.vector_store %arg17[%c0_42, %c0_43], %67 {strides = array<i32>} : memref<2x256xf32, #tpu.memory_space<vmem>>, vector<2x256xf32>,
    return
  }
  func.func @transform_0(%arg0: i32) -> (i32, i32) {
    %c0_i32 = arith.constant 0 : i32
    %c0_i32_0 = arith.constant 0 : i32
    return %arg0, %c0_i32 : i32, i32
  }
  func.func @transform_1(%arg0: i32) -> (i32, i32) {
    %c0_i32 = arith.constant 0 : i32
    %c0_i32_0 = arith.constant 0 : i32
    return %arg0, %c0_i32 : i32, i32
  }
  func.func @transform_2(%arg0: i32) -> (i32, i32) {
    %c0_i32 = arith.constant 0 : i32
    %c0_i32_0 = arith.constant 0 : i32
    %c0_i32_1 = arith.constant 0 : i32
    return %c0_i32, %c0_i32_0 : i32, i32
  }
  func.func @transform_3(%arg0: i32) -> (i32, i32) {
    %c0_i32 = arith.constant 0 : i32
    %c0_i32_0 = arith.constant 0 : i32
    %c0_i32_1 = arith.constant 0 : i32
    return %c0_i32, %c0_i32_0 : i32, i32
  }
  func.func @transform_4(%arg0: i32) -> (i32, i32) {
    %c0_i32 = arith.constant 0 : i32
    %c0_i32_0 = arith.constant 0 : i32
    %c0_i32_1 = arith.constant 0 : i32
    return %c0_i32, %c0_i32_0 : i32, i32
  }
  func.func @transform_5(%arg0: i32) -> (i32, i32) {
    %c0_i32 = arith.constant 0 : i32
    %c0_i32_0 = arith.constant 0 : i32
    %c0_i32_1 = arith.constant 0 : i32
    return %c0_i32, %c0_i32_0 : i32, i32
  }
  func.func @transform_6(%arg0: i32) -> (i32, i32) {
    %c0_i32 = arith.constant 0 : i32
    %c0_i32_0 = arith.constant 0 : i32
    %c0_i32_1 = arith.constant 0 : i32
    return %c0_i32, %c0_i32_0 : i32, i32
  }
  func.func @transform_7(%arg0: i32) -> (i32, i32) {
    %c0_i32 = arith.constant 0 : i32
    %c0_i32_0 = arith.constant 0 : i32
    %c0_i32_1 = arith.constant 0 : i32
    return %c0_i32, %c0_i32_0 : i32, i32
  }
  func.func @transform_8(%arg0: i32) -> (i32, i32) {
    %c0_i32 = arith.constant 0 : i32
    %c0_i32_0 = arith.constant 0 : i32
    %c0_i32_1 = arith.constant 0 : i32
    return %c0_i32, %c0_i32_0 : i32, i32
  }
  func.func @transform_9(%arg0: i32) -> (i32, i32) {
    %c0_i32 = arith.constant 0 : i32
    %c0_i32_0 = arith.constant 0 : i32
    %c0_i32_1 = arith.constant 0 : i32
    return %c0_i32, %c0_i32_0 : i32, i32
  }
  func.func @transform_10(%arg0: i32) -> (i32, i32) {
    %c0_i32 = arith.constant 0 : i32
    %c0_i32_0 = arith.constant 0 : i32
    %c0_i32_1 = arith.constant 0 : i32
    return %c0_i32, %c0_i32_0 : i32, i32
  }
  func.func @transform_11(%arg0: i32) -> (i32, i32) {
    %c0_i32 = arith.constant 0 : i32
    %c0_i32_0 = arith.constant 0 : i32
    %c0_i32_1 = arith.constant 0 : i32
    return %c0_i32, %c0_i32_0 : i32, i32
  }
  func.func @transform_12(%arg0: i32) -> (i32, i32) {
    %c0_i32 = arith.constant 0 : i32
    %c0_i32_0 = arith.constant 0 : i32
    %c0_i32_1 = arith.constant 0 : i32
    return %c0_i32, %c0_i32_0 : i32, i32
  }
  func.func @transform_13(%arg0: i32) -> (i32, i32) {
    %c0_i32 = arith.constant 0 : i32
    %c0_i32_0 = arith.constant 0 : i32
    %c0_i32_1 = arith.constant 0 : i32
    return %c0_i32, %c0_i32_0 : i32, i32
  }
  func.func @transform_14(%arg0: i32) -> (i32, i32) {
    %c0_i32 = arith.constant 0 : i32
    %c0_i32_0 = arith.constant 0 : i32
    %c0_i32_1 = arith.constant 0 : i32
    return %c0_i32, %c0_i32_0 : i32, i32
  }
  func.func @transform_15(%arg0: i32) -> i32 {
    %c0_i32 = arith.constant 0 : i32
    %c0_i32_0 = arith.constant 0 : i32
    return %c0_i32 : i32
  }
  func.func @transform_16(%arg0: i32) -> (i32, i32) {
    %c0_i32 = arith.constant 0 : i32
    %c0_i32_0 = arith.constant 0 : i32
    return %arg0, %c0_i32 : i32, i32
  }
}

</mosaic_0001>

<bundles_post_ra>
// kernel: tpu_custom_call.1
= control target key start
LH: loop header
LB: loop body
LE: loop exit
PB: predicated region body
PF: predicated region fallthrough
CT: control target
= control target key end

     0   :  { %s5343_s0 = inlined_call_operand.hbm [shape: f32[2,32], index: 0, kind: input, shape index: {}]   ;;  %s5344_s1 = inlined_call_operand.vmem [shape: f32[2,32], index: 1, kind: input, shape index: {}]   ;;  %s5345_s2 = inlined_call_operand.hbm [shape: f32[32,128], index: 2, kind: input, shape index: {}]   ;;  %s5346_s3 = inlined_call_operand.hbm [shape: f32[1,128], index: 3, kind: input, shape index: {}]   ;;  %s5347_s4 = inlined_call_operand.hbm [shape: bf16[128,512], index: 4, kind: input, shape index: {}]   ;;  %s5348_s5 = inlined_call_operand.vmem [shape: f32[1,512], index: 5, kind: input, shape index: {}]   ;;  %s5349_s6 = inlined_call_operand.hbm [shape: bf16[512,1024], index: 6, kind: input, shape index: {}]   ;;  %s5350_s7 = inlined_call_operand.vmem [shape: f32[1,512], index: 7, kind: input, shape index: {}]   ;;  %s5351_s8 = inlined_call_operand.hbm [shape: bf16[512,256], index: 8, kind: input, shape index: {}]   ;;  %s5352_s9 = inlined_call_operand.vmem [shape: f32[1,256], index: 9, kind: input, shape index: {}]   ;;  %s5353_s10 = inlined_call_operand.hbm [shape: bf16[32,512], index: 10, kind: input, shape index: {}]   ;;  %s5354_s11 = inlined_call_operand.vmem [shape: f32[1,512], index: 11, kind: input, shape index: {}]   ;;  %s5355_s12 = inlined_call_operand.hbm [shape: bf16[512,256], index: 12, kind: input, shape index: {}]   ;;  %s5356_s13 = inlined_call_operand.vmem [shape: f32[1,256], index: 13, kind: input, shape index: {}]   ;;  %s5357_s14 = inlined_call_operand.hbm [shape: bf16[256,256], index: 14, kind: input, shape index: {}]   ;;  %s5358_s15 = inlined_call_operand.vmem [shape: f32[4], index: 15, kind: input, shape index: {}]   ;;  %s5359_s16 = inlined_call_operand.hbm [shape: f32[2,256], index: 16, kind: output, shape index: {}]  }
   0x1   :  { %5366 = sst [smem:[#allocation27_spill]] %s5343_s0 }
   0x2   :  { %21 = vsyncpa [#allocation3], 0 }
   0x3   :  { %22 = vsyncpa [#allocation7], 0 }
   0x4   :  { %23 = vsyncpa [#allocation10], 0 }
   0x5   :  { %24 = vsyncpa [#allocation13], 0 }
   0x6   :  { %25 = vsyncpa [#allocation16], 0 }
   0x7   :  { %26 = vsyncpa [#allocation5], 0 }
   0x8   :  { %27 = vsyncpa [#allocation4], 0  ;;  %s4967_s21 = smov [#allocation6]   ;;  %s4721_s25 = scalar_lea.hbm %s5345_s2, 512 }
   0x9   :  { %s45_s22 = sshll.u32 %s4967_s21, 4  ;;  %p4722_p0 = scmp.ne.s32.totalorder %s5345_s2, %s4721_s25  ;;  %s46_s22 = int_to_ptr.vmem [resolvable:$true] %s45_s22 }
   0xa   :  { %p4725_p1 = scmp.lt.u32.totalorder %s4721_s25, %s5345_s2 }
   0xc   :  { %p4727_p2 = pnand %p4725_p1, %p4722_p0 }
   0xe   :  { %4730 = shalt.err (!%p4727_p2)
}
   0xf   :  { %s4731_s30 = scalar_lea.vmem %s46_s22, 512  ;;  %p4736_p4 = scmp.lt.s32.totalorder %s46_s22, %s46_s22 }
  0x10   :  { %p4732_p3 = scmp.ne.s32.totalorder %s46_s22, %s4731_s30  ;;  %p4737_p5 = scmp.lt.s32.totalorder %s4731_s30, %s4731_s30 }
  0x12   :  { %p4738_p6 = por %p4737_p5, %p4736_p4 }
  0x14   :  { %p4739_p7 = pnand %p4738_p6, %p4732_p3 }
  0x16   :  { %4742 = shalt.err (!%p4739_p7)
}
  0x17   :  { %s5361_s0 = smov 128   ;;  %s5363_s17 = smov 8  }
  0x18   :  { %51 = dma.hbm_to_vmem [thread:$0]  %s5345_s2, 512, %s46_s22, [#allocation7], %s5361_s0, %s5361_s0, %s5363_s17  }
  0x19   :  { %s4970_s20 = smov [#allocation9]   ;;  %s4743_s25 = scalar_lea.hbm %s5347_s4, 4096 }
  0x1a   :  { %s67_s21 = sshll.u32 %s4970_s20, 4  ;;  %p4744_p8 = scmp.ne.s32.totalorder %s5347_s4, %s4743_s25  ;;  %s68_s21 = int_to_ptr.vmem [resolvable:$true] %s67_s21 }
  0x1b   :  { %p4747_p9 = scmp.lt.u32.totalorder %s4743_s25, %s5347_s4 }
  0x1d   :  { %p4749_p10 = pnand %p4747_p9, %p4744_p8 }
  0x1f   :  { %4752 = shalt.err (!%p4749_p10)
}
  0x20   :  { %s4753_s30 = scalar_lea.vmem %s68_s21, 4096  ;;  %p4758_p12 = scmp.lt.s32.totalorder %s68_s21, %s68_s21 }
  0x21   :  { %p4754_p11 = scmp.ne.s32.totalorder %s68_s21, %s4753_s30  ;;  %p4759_p13 = scmp.lt.s32.totalorder %s4753_s30, %s4753_s30 }
  0x23   :  { %p4760_p0 = por %p4759_p13, %p4758_p12 }
  0x25   :  { %p4761_p1 = pnand %p4760_p0, %p4754_p11 }
  0x27   :  { %4764 = shalt.err (!%p4761_p1)
}
  0x28   :  { %s5365_s2 = smov 256   ;;  %s4972_s22 = smov 16  }
  0x29   :  { %73 = dma.hbm_to_vmem [thread:$0]  %s5347_s4, 4096, %s68_s21, [#allocation10], %s5365_s2, %s5365_s2, %s4972_s22  }
  0x2a   :  { %s4973_s20 = smov [#allocation12]   ;;  %s4974_s24 = smov [#allocation15]  }
  0x2b   :  { %s95_s23 = sshll.u32 %s4973_s20, 4  ;;  %s123_s25 = sshll.u32 %s4974_s24, 4  ;;  %s96_s23 = int_to_ptr.vmem [resolvable:$true] %s95_s23  ;;  %s5103_s25 = int_to_ptr.vmem [resolvable:$true] %s123_s25 }
  0x2c   :  { %s4765_s28 = scalar_lea.hbm %s5351_s8, 8192 }
  0x2d   :  { %p4766_p2 = scmp.ne.s32.totalorder %s5351_s8, %s4765_s28  ;;  %p4769_p3 = scmp.lt.u32.totalorder %s4765_s28, %s5351_s8 }
  0x2f   :  { %p4771_p4 = pnand %p4769_p3, %p4766_p2 }
  0x31   :  { %4774 = shalt.err (!%p4771_p4)
}
  0x32   :  { %s4775_s4 = scalar_lea.vmem %s96_s23, 8192  ;;  %p4780_p6 = scmp.lt.s32.totalorder %s96_s23, %s96_s23 }
  0x33   :  { %p4776_p5 = scmp.ne.s32.totalorder %s96_s23, %s4775_s4  ;;  %p4781_p7 = scmp.lt.s32.totalorder %s4775_s4, %s4775_s4 }
  0x35   :  { %p4782_p8 = por %p4781_p7, %p4780_p6 }
  0x37   :  { %p4783_p9 = pnand %p4782_p8, %p4776_p5 }
  0x39   :  { %4786 = shalt.err (!%p4783_p9)
}
  0x3a   :  { %s5367_s21 = smov 8   ;;  %s5368_s18 = smov 128  }
  0x3b   :  { %101 = dma.hbm_to_vmem [thread:$0]  %s5351_s8, 8192, %s96_s23, [#allocation13], %s5368_s18, %s5368_s18, %s5367_s21  }
  0x3c   :  { %s4787_s0 = scalar_lea.hbm %s5355_s12, 8192 }
  0x3d   :  { %p4788_p10 = scmp.ne.s32.totalorder %s5355_s12, %s4787_s0  ;;  %p4791_p11 = scmp.lt.u32.totalorder %s4787_s0, %s5355_s12 }
  0x3f   :  { %p4793_p12 = pnand %p4791_p11, %p4788_p10 }
  0x41   :  { %4796 = shalt.err (!%p4793_p12)
}
  0x42   :  { %s4797_s30 = scalar_lea.vmem %s5103_s25, 8192  ;;  %p4802_p0 = scmp.lt.s32.totalorder %s5103_s25, %s5103_s25 }
  0x43   :  { %p4798_p13 = scmp.ne.s32.totalorder %s5103_s25, %s4797_s30  ;;  %p4803_p1 = scmp.lt.s32.totalorder %s4797_s30, %s4797_s30 }
  0x45   :  { %p4804_p2 = por %p4803_p1, %p4802_p0 }
  0x47   :  { %p4805_p3 = pnand %p4804_p2, %p4798_p13 }
  0x49   :  { %4808 = shalt.err (!%p4805_p3)
}
  0x4a   :  { %129 = dma.hbm_to_vmem [thread:$0]  %s5355_s12, 8192, %s5103_s25, [#allocation16], %s5368_s18, %s5368_s18, %s5367_s21  }
  0x4b   :  { %s4975_s4 = smov [#allocation2]   ;;  %s4976_s20 = smov [#allocation8]  }
  0x4c   :  { %s34_s19 = sshll.u32 %s4975_s4, 4  ;;  %s58_s24 = sshll.u32 %s4976_s20, 4  ;;  %s35_s19 = int_to_ptr.vmem [resolvable:$true] %s34_s19  ;;  %s59_s24 = int_to_ptr.vmem [resolvable:$true] %s58_s24 }
  0x4d   :  { %s5369_s17 = sld [smem:[#allocation27_spill]] }
  0x53   :  { %s4809_s27 = scalar_lea.hbm %s5369_s17, 32 }
  0x54   :  { %p4810_p4 = scmp.ne.s32.totalorder %s5369_s17, %s4809_s27  ;;  %p4813_p5 = scmp.lt.u32.totalorder %s4809_s27, %s5369_s17 }
  0x56   :  { %p4815_p6 = pnand %p4813_p5, %p4810_p4 }
  0x58   :  { %4818 = shalt.err (!%p4815_p6)
}
  0x59   :  { %s4819_s12 = scalar_lea.vmem %s35_s19, 32  ;;  %p4824_p8 = scmp.lt.s32.totalorder %s35_s19, %s35_s19 }
  0x5a   :  { %p4820_p7 = scmp.ne.s32.totalorder %s35_s19, %s4819_s12  ;;  %p4825_p9 = scmp.lt.s32.totalorder %s4819_s12, %s4819_s12 }
  0x5c   :  { %p4826_p10 = por %p4825_p9, %p4824_p8 }
  0x5e   :  { %p4827_p11 = pnand %p4826_p10, %p4820_p7 }
  0x60   :  { %4830 = shalt.err (!%p4827_p11)
}
  0x61   :  { %37 = dma.hbm_to_vmem [thread:$0]  %s5369_s17, 32, %s35_s19, [#allocation3]  }
  0x62   :  { %s4831_s20 = scalar_lea.hbm %s5346_s3, 16 }
  0x63   :  { %p4832_p12 = scmp.ne.s32.totalorder %s5346_s3, %s4831_s20  ;;  %p4835_p13 = scmp.lt.u32.totalorder %s4831_s20, %s5346_s3 }
  0x65   :  { %p4837_p0 = pnand %p4835_p13, %p4832_p12 }
  0x67   :  { %4840 = shalt.err (!%p4837_p0)
}
  0x68   :  { %s4841_s28 = scalar_lea.vmem %s59_s24, 16  ;;  %s4845_s29 = scalar_lea.vmem %s59_s24, 32 }
  0x69   :  { %p4842_p1 = scmp.ne.s32.totalorder %s59_s24, %s4841_s28  ;;  %p4846_p2 = scmp.lt.s32.totalorder %s59_s24, %s59_s24 }
  0x6a   :  { %p4847_p3 = scmp.lt.s32.totalorder %s4845_s29, %s4841_s28 }
  0x6c   :  { %p4848_p4 = por %p4847_p3, %p4846_p2 }
  0x6e   :  { %p4849_p5 = pnand %p4848_p4, %p4842_p1 }
  0x70   :  { %4852 = shalt.err (!%p4849_p5)
}
  0x71   :  { %61 = dma.hbm_to_vmem [thread:$0]  %s5346_s3, 16, %s59_s24, [#allocation7]  }
  0x72   :  { %s4977_s30 = smov [#allocation11]   ;;  %s4853_s23 = scalar_lea.hbm %s5349_s6, 32768 }
  0x73   :  { %s81_s12 = sshll.u32 %s4977_s30, 4  ;;  %p4854_p6 = scmp.ne.s32.totalorder %s5349_s6, %s4853_s23  ;;  %s82_s12 = int_to_ptr.vmem [resolvable:$true] %s81_s12 }
  0x74   :  { %p4857_p7 = scmp.lt.u32.totalorder %s4853_s23, %s5349_s6 }
  0x76   :  { %p4859_p8 = pnand %p4857_p7, %p4854_p6 }
  0x78   :  { %4862 = shalt.err (!%p4859_p8)
}
  0x79   :  { %s4863_s0 = scalar_lea.vmem %s82_s12, 32768  ;;  %p4868_p10 = scmp.lt.s32.totalorder %s82_s12, %s82_s12 }
  0x7a   :  { %p4864_p9 = scmp.ne.s32.totalorder %s82_s12, %s4863_s0  ;;  %p4869_p11 = scmp.lt.s32.totalorder %s4863_s0, %s4863_s0 }
  0x7c   :  { %p4870_p12 = por %p4869_p11, %p4868_p10 }
  0x7e   :  { %p4871_p13 = pnand %p4870_p12, %p4864_p9 }
  0x80   :  { %4874 = shalt.err (!%p4871_p13)
}
  0x81   :  { %s4978_s3 = smov 512   ;;  %s4979_s24 = smov 32  }
  0x82   :  { %87 = dma.hbm_to_vmem [thread:$0]  %s5349_s6, 32768, %s82_s12, [#allocation10], %s4978_s3, %s4978_s3, %s4979_s24  }
  0x83   :  { %s4980_s29 = smov [#allocation14]   ;;  %s4981_s17 = smov [#allocation17]  }
  0x84   :  { %s109_s19 = sshll.u32 %s4980_s29, 4  ;;  %s137_s30 = sshll.u32 %s4981_s17, 4  ;;  %s110_s19 = int_to_ptr.vmem [resolvable:$true] %s109_s19  ;;  %s138_s30 = int_to_ptr.vmem [resolvable:$true] %s137_s30 }
  0x85   :  { %s4875_s23 = scalar_lea.hbm %s5353_s10, 1024 }
  0x86   :  { %p4876_p0 = scmp.ne.s32.totalorder %s5353_s10, %s4875_s23  ;;  %p4879_p1 = scmp.lt.u32.totalorder %s4875_s23, %s5353_s10 }
  0x88   :  { %p4881_p2 = pnand %p4879_p1, %p4876_p0 }
  0x8a   :  { %4884 = shalt.err (!%p4881_p2)
}
  0x8b   :  { %s4885_s6 = scalar_lea.vmem %s110_s19, 1024  ;;  %p4890_p4 = scmp.lt.s32.totalorder %s110_s19, %s110_s19 }
  0x8c   :  { %p4886_p3 = scmp.ne.s32.totalorder %s110_s19, %s4885_s6  ;;  %p4891_p5 = scmp.lt.s32.totalorder %s4885_s6, %s4885_s6 }
  0x8e   :  { %p4892_p6 = por %p4891_p5, %p4890_p4 }
  0x90   :  { %p4893_p7 = pnand %p4892_p6, %p4886_p3 }
  0x92   :  { %4896 = shalt.err (!%p4893_p7)
}
  0x93   :  { %s5370_s12 = smov 256   ;;  %s150_s28 = sshll.u32 %s5358_s15, 4  ;;  %s151_s28 = int_to_ptr.vmem [resolvable:$true] %s150_s28 }
  0x94   :  { %115 = dma.hbm_to_vmem [thread:$0]  %s5353_s10, 1024, %s110_s19, [#allocation13], %s5370_s12, %s5370_s12, %s4972_s22  }
  0x95   :  { %s4897_s25 = scalar_lea.hbm %s5357_s14, 4096 }
  0x96   :  { %p4898_p8 = scmp.ne.s32.totalorder %s5357_s14, %s4897_s25  ;;  %p4901_p9 = scmp.lt.u32.totalorder %s4897_s25, %s5357_s14 }
  0x98   :  { %p4903_p10 = pnand %p4901_p9, %p4898_p8 }
  0x9a   :  { %4906 = shalt.err (!%p4903_p10)
}
  0x9b   :  { %s4907_s10 = scalar_lea.vmem %s138_s30, 4096  ;;  %p4912_p12 = scmp.lt.s32.totalorder %s138_s30, %s138_s30 }
  0x9c   :  { %p4908_p11 = scmp.ne.s32.totalorder %s138_s30, %s4907_s10  ;;  %p4913_p13 = scmp.lt.s32.totalorder %s4907_s10, %s4907_s10 }
  0x9e   :  { %p4914_p0 = por %p4913_p13, %p4912_p12 }
  0xa0   :  { %p4915_p1 = pnand %p4914_p0, %p4908_p11 }
  0xa2   :  { %4918 = shalt.err (!%p4915_p1)
}
  0xa3   :  { %143 = dma.hbm_to_vmem [thread:$0]  %s5357_s14, 4096, %s138_s30, [#allocation16], %s5368_s18, %s5368_s18, %s5367_s21  }
  0xa4   :  { %s4919_s19 = scalar_lea.vmem %s151_s28, 16  ;;  %p4924_p3 = scmp.lt.s32.totalorder %s151_s28, %s151_s28 }
  0xa5   :  { %p4920_p2 = scmp.ne.s32.totalorder %s151_s28, %s4919_s19  ;;  %p4925_p4 = scmp.lt.s32.totalorder %s4919_s19, %s4919_s19 }
  0xa7   :  { %p4926_p5 = por %p4925_p4, %p4924_p3 }
  0xa9   :  { %p4927_p6 = pnand %p4926_p5, %p4920_p2 }
  0xab   :  { %4930 = shalt.err (!%p4927_p6)
}
  0xac   :  { %s4982_s26 = smov [#allocation18]  }
  0xad   :  { %153 = dma.vmem_to_smem %s151_s28, 16, %s4982_s26, [#allocation5]  }
  0xae   :  { %4953 = dma.done.wait [#allocation3], 32  }
  0xaf   :  { %4954 = vsyncadd [#allocation3], 4294967264 }
  0xb0   :  { %4955 = dma.done.wait [#allocation7], 528  }
  0xb1   :  { %4956 = vsyncadd [#allocation7], 4294966768 }
  0xb2   :  { %4957 = dma.done.wait [#allocation10], 36864  }
  0xb3   :  { %4958 = vsyncadd [#allocation10], 4294930432 }
  0xb4   :  { %4959 = dma.done.wait [#allocation13], 9216  }
  0xb5   :  { %4960 = vsyncadd [#allocation13], 4294958080 }
  0xb6   :  { %4961 = dma.done.wait [#allocation16], 12288  }
  0xb7   :  { %4962 = vsyncadd [#allocation16], 4294955008 }
  0xb8   :  { %4963 = dma.done.wait [#allocation5], 16  }
  0xb9   :  { %4964 = vsyncadd [#allocation5], 4294967280 }
  0xba   :  { %184 = sfence }
  0xbb   :  { %v187_v0 = vld [vmem:[#allocation6] sm:$0xff]  ;;  %v188_v1 = vld [vmem:[#allocation6 + $0x8] sm:$0xff]  ;;  %v189_v2 = vld [vmem:[#allocation6 + $0x10] sm:$0xff]  ;;  %v4983_v3 = vmov 0.0|0.0   ;;  %vm4984_vm0 = vmmov 0   ;;  %v4985_v6 = vmov 0.0  }
  0xbc   :  { %4374 = vmatprep.subr.bf16.mxu1 %v4983_v3  ;;  %v4375_v4 = vpack.c.bf16 %v188_v1, %v187_v0  ;;  %v190_v5 = vld [vmem:[#allocation6 + $0x18] sm:$0xff]  ;;  %4371 = vmatprep.mubr.msk.f32.mxu1 %vm4984_vm0, %v4985_v6  ;;  %v4423_v8 = vld [vmem:[#allocation9] ss:$16 sps:$4 sm:$0xff]   ;;  %vm198_vm1 = vcmask 261120   ;;  %v4986_v26 = vmov 0   ;;  %s273_s2 = sld [smem:[#allocation18]] }
  0xbd   :  { %v4421_v7 = vld [vmem:[#allocation9 + $0x4] ss:$16 sps:$4 sm:$0xff]   ;;  %v4378_v9 = vpack.c.bf16 %v190_v5, %v189_v2  ;;  %v4426_v11 = vld [vmem:[#allocation9 + $0x20] ss:$16 sps:$4 sm:$0xff]   ;;  %v186_v13 = vld [vmem:[#allocation2] sm:$0x3]  ;;  %524 = vmatprep.mubr.bf16.mxu0 %v4986_v26 }
  0xbe   :  { %4376 = vmatpush3.bf16.msra.mxu1 %v4375_v4  ;;  %v4424_v10 = vld [vmem:[#allocation9 + $0x24] ss:$16 sps:$4 sm:$0xff]   ;;  %492 = vmatprep.subr.bf16.mxu0 %v4421_v7  ;;  %v4429_v14 = vld [vmem:[#allocation9 + $0x40] ss:$16 sps:$4 sm:$0xff]   ;;  %v4447_v25 = vld [vmem:[#allocation9 + $0xc] ss:$16 sps:$4 sm:$0xff]  }
  0xbf   :  { %4377 = vmatprep.subr.bf16.mxu1 %v4983_v3  ;;  %493 = vmatpush1.bf16.msra.mxu0 %v4423_v8  ;;  %v4427_v12 = vld [vmem:[#allocation9 + $0x44] ss:$16 sps:$4 sm:$0xff]   ;;  %v4432_v16 = vld [vmem:[#allocation9 + $0x60] ss:$16 sps:$4 sm:$0xff]   ;;  %s3898_s27 = sld [smem:[#allocation18 + $0x3]] }
  0xc0   :  { %494 = vmatprep.subr.bf16.mxu0 %v4424_v10  ;;  %v4430_v15 = vld [vmem:[#allocation9 + $0x64] ss:$16 sps:$4 sm:$0xff]   ;;  %v4435_v18 = vld [vmem:[#allocation9 + $0x80] ss:$16 sps:$4 sm:$0xff]  }
  0xc1   :  { %v4433_v17 = vld [vmem:[#allocation9 + $0x84] ss:$16 sps:$4 sm:$0xff]   ;;  %v4438_v20 = vld [vmem:[#allocation9 + $0xa0] ss:$16 sps:$4 sm:$0xff]  }
  0xc2   :  { %4379 = vmatpush3.bf16.msra.mxu1 %v4378_v9  ;;  %v4436_v19 = vld [vmem:[#allocation9 + $0xa4] ss:$16 sps:$4 sm:$0xff]   ;;  %v4441_v22 = vld [vmem:[#allocation9 + $0xc0] ss:$16 sps:$4 sm:$0xff]  }
  0xc3   :  { %495 = vmatpush1.bf16.msra.mxu0 %v4426_v11  ;;  %v4439_v21 = vld [vmem:[#allocation9 + $0xc4] ss:$16 sps:$4 sm:$0xff]   ;;  %v4444_v24 = vld [vmem:[#allocation9 + $0xe0] ss:$16 sps:$4 sm:$0xff]  }
  0xc4   :  { %496 = vmatprep.subr.bf16.mxu0 %v4427_v12  ;;  %v4442_v23 = vld [vmem:[#allocation9 + $0xe4] ss:$16 sps:$4 sm:$0xff]  }
  0xc5   :  { %4372 = vmatmul.mubr.msk.f32.vlgmr.msra.gmra.mrb[0].mxu1 %vm198_vm1, %v186_v13  ;;  %v582_v27 = vld [vmem:[#allocation11] sm:$0xff] }
  0xc6   :  { %v586_v28 = vld [vmem:[#allocation11 + $0x20] sm:$0xff] }
  0xc7   :  { %497 = vmatpush1.bf16.msra.mxu0 %v4429_v14  ;;  %v590_v29 = vld [vmem:[#allocation11 + $0x40] sm:$0xff]  ;;  %v3931_v30 = vcombine.low %v582_v27, %v586_v28  ;;  %v3932_v31 = vcombine.high %v582_v27, %v586_v28  ;;  %v4450_v27 = vld [vmem:[#allocation9 + $0x2c] ss:$16 sps:$4 sm:$0xff]   ;;  %v4448_v28 = vld [vmem:[#allocation9 + $0x28] ss:$16 sps:$4 sm:$0xff]  }
  0xc8   :  { %498 = vmatprep.subr.bf16.mxu0 %v4430_v15  ;;  %v594_v32 = vld [vmem:[#allocation11 + $0x60] sm:$0xff] }
  0xc9   :  { %v3940_v33 = vcombine.high %v590_v29, %v594_v32  ;;  %v598_v34 = vld [vmem:[#allocation11 + $0x80] sm:$0xff]  ;;  %2118 = vmatprep.subr.bf16.mxu1 %v3932_v31  ;;  %v3939_v36 = vcombine.low %v590_v29, %v594_v32  ;;  %v4453_v29 = vld [vmem:[#allocation9 + $0x4c] ss:$16 sps:$4 sm:$0xff]   ;;  %v4454_v32 = vld [vmem:[#allocation9 + $0x68] ss:$16 sps:$4 sm:$0xff]  }
  0xca   :  { %v602_v35 = vld [vmem:[#allocation11 + $0xa0] sm:$0xff]  ;;  %2119 = vmatpush1.bf16.msra.mxu1 %v3931_v30  ;;  %v4451_v30 = vld [vmem:[#allocation9 + $0x48] ss:$16 sps:$4 sm:$0xff]   ;;  %v4456_v31 = vld [vmem:[#allocation9 + $0x6c] ss:$16 sps:$4 sm:$0xff]  }
  0xcb   :  { %499 = vmatpush1.bf16.msra.mxu0 %v4432_v16  ;;  %2120 = vmatprep.subr.bf16.mxu1 %v3940_v33  ;;  %v3948_v37 = vcombine.high %v598_v34, %v602_v35  ;;  %v606_v38 = vld [vmem:[#allocation11 + $0xc0] sm:$0xff]  ;;  %v3947_v40 = vcombine.low %v598_v34, %v602_v35  ;;  %v4459_v33 = vld [vmem:[#allocation9 + $0x8c] ss:$16 sps:$4 sm:$0xff]   ;;  %v4457_v34 = vld [vmem:[#allocation9 + $0x88] ss:$16 sps:$4 sm:$0xff]  }
  0xcc   :  { %500 = vmatprep.subr.bf16.mxu0 %v4433_v17  ;;  %v610_v39 = vld [vmem:[#allocation11 + $0xe0] sm:$0xff]  ;;  %v4462_v35 = vld [vmem:[#allocation9 + $0xac] ss:$16 sps:$4 sm:$0xff]  }
  0xcd   :  { %v3956_v41 = vcombine.high %v606_v38, %v610_v39  ;;  %v614_v42 = vld [vmem:[#allocation11 + $0x100] sm:$0xff]  ;;  %v3955_v44 = vcombine.low %v606_v38, %v610_v39  ;;  %v4463_v38 = vld [vmem:[#allocation9 + $0xc8] ss:$16 sps:$4 sm:$0xff]   ;;  %v4468_v39 = vld [vmem:[#allocation9 + $0xec] ss:$16 sps:$4 sm:$0xff]  }
  0xce   :  { %2121 = vmatpush1.bf16.msra.mxu1 %v3939_v36  ;;  %v618_v43 = vld [vmem:[#allocation11 + $0x120] sm:$0xff]  ;;  %v4460_v36 = vld [vmem:[#allocation9 + $0xa8] ss:$16 sps:$4 sm:$0xff]  }
  0xcf   :  { %501 = vmatpush1.bf16.msra.mxu0 %v4435_v18  ;;  %2122 = vmatprep.subr.bf16.mxu1 %v3948_v37  ;;  %v3964_v45 = vcombine.high %v614_v42, %v618_v43  ;;  %v622_v46 = vld [vmem:[#allocation11 + $0x140] sm:$0xff]  ;;  %v3963_v48 = vcombine.low %v614_v42, %v618_v43  ;;  %v4465_v37 = vld [vmem:[#allocation9 + $0xcc] ss:$16 sps:$4 sm:$0xff]   ;;  %v4466_v42 = vld [vmem:[#allocation9 + $0xe8] ss:$16 sps:$4 sm:$0xff]  }
  0xd0   :  { %502 = vmatprep.subr.bf16.mxu0 %v4436_v19  ;;  %v626_v47 = vld [vmem:[#allocation11 + $0x160] sm:$0xff]  ;;  %v3894_v19 = vld [vmem:[#allocation8] ss:$0 sm:$0xff] }
  0xd1   :  { %v3972_v49 = vcombine.high %v622_v46, %v626_v47  ;;  %v630_v50 = vld [vmem:[#allocation11 + $0x180] sm:$0xff]  ;;  %v3971_v52 = vcombine.low %v622_v46, %v626_v47 }
  0xd2   :  { %2123 = vmatpush1.bf16.msra.mxu1 %v3947_v40  ;;  %v634_v51 = vld [vmem:[#allocation11 + $0x1a0] sm:$0xff] }
  0xd3   :  { %503 = vmatpush1.bf16.msra.mxu0 %v4438_v20  ;;  %2124 = vmatprep.subr.bf16.mxu1 %v3956_v41  ;;  %v3980_v53 = vcombine.high %v630_v50, %v634_v51  ;;  %v638_v54 = vld [vmem:[#allocation11 + $0x1c0] sm:$0xff]  ;;  %v3979_v56 = vcombine.low %v630_v50, %v634_v51 }
  0xd4   :  { %504 = vmatprep.subr.bf16.mxu0 %v4439_v21  ;;  %v642_v55 = vld [vmem:[#allocation11 + $0x1e0] sm:$0xff] }
  0xd5   :  { %v3988_v57 = vcombine.high %v638_v54, %v642_v55  ;;  %v646_v58 = vld [vmem:[#allocation11 + $0x200] sm:$0xff]  ;;  %v3987_v60 = vcombine.low %v638_v54, %v642_v55 }
  0xd6   :  { %2125 = vmatpush1.bf16.msra.mxu1 %v3955_v44  ;;  %v650_v59 = vld [vmem:[#allocation11 + $0x220] sm:$0xff] }
  0xd7   :  { %505 = vmatpush1.bf16.msra.mxu0 %v4441_v22  ;;  %2126 = vmatprep.subr.bf16.mxu1 %v3964_v45  ;;  %v3996_v61 = vcombine.high %v646_v58, %v650_v59  ;;  %v654_v62 = vld [vmem:[#allocation11 + $0x240] sm:$0xff]  ;;  %v3995_v0 = vcombine.low %v646_v58, %v650_v59 }
  0xd8   :  { %506 = vmatprep.subr.bf16.mxu0 %v4442_v23  ;;  %v658_v63 = vld [vmem:[#allocation11 + $0x260] sm:$0xff] }
  0xd9   :  { %v4004_v1 = vcombine.high %v654_v62, %v658_v63  ;;  %v662_v2 = vld [vmem:[#allocation11 + $0x280] sm:$0xff]  ;;  %v4003_v4 = vcombine.low %v654_v62, %v658_v63 }
  0xda   :  { %2127 = vmatpush1.bf16.msra.mxu1 %v3963_v48  ;;  %v666_v3 = vld [vmem:[#allocation11 + $0x2a0] sm:$0xff] }
  0xdb   :  { %507 = vmatpush1.bf16.msra.mxu0 %v4444_v24  ;;  %2128 = vmatprep.subr.bf16.mxu1 %v3972_v49  ;;  %v4012_v5 = vcombine.high %v662_v2, %v666_v3  ;;  %v670_v6 = vld [vmem:[#allocation11 + $0x2c0] sm:$0xff]  ;;  %v4011_v8 = vcombine.low %v662_v2, %v666_v3  ;;  %v4445_v24 = vld [vmem:[#allocation9 + $0x8] ss:$16 sps:$4 sm:$0xff]  }
  0xdc   :  { %533 = vmatprep.subr.bf16.mxu0 %v4447_v25  ;;  %v674_v7 = vld [vmem:[#allocation11 + $0x2e0] sm:$0xff] }
  0xdd   :  { %v4020_v9 = vcombine.high %v670_v6, %v674_v7  ;;  %v678_v10 = vld [vmem:[#allocation11 + $0x300] sm:$0xff]  ;;  %v4019_v12 = vcombine.low %v670_v6, %v674_v7 }
  0xde   :  { %2129 = vmatpush1.bf16.msra.mxu1 %v3971_v52  ;;  %v682_v11 = vld [vmem:[#allocation11 + $0x320] sm:$0xff] }
  0xdf   :  { %2130 = vmatprep.subr.bf16.mxu1 %v3980_v53  ;;  %v4028_v13 = vcombine.high %v678_v10, %v682_v11  ;;  %v686_v14 = vld [vmem:[#allocation11 + $0x340] sm:$0xff]  ;;  %v4027_v16 = vcombine.low %v678_v10, %v682_v11 }
  0xe0   :  { %v690_v15 = vld [vmem:[#allocation11 + $0x360] sm:$0xff] }
  0xe1   :  { %v4036_v17 = vcombine.high %v686_v14, %v690_v15  ;;  %v4035_v18 = vcombine.low %v686_v14, %v690_v15  ;;  %v710_v40 = vld [vmem:[#allocation11 + $0x400] sm:$0xff] }
  0xe2   :  { %2131 = vmatpush1.bf16.msra.mxu1 %v3979_v56  ;;  %v714_v41 = vld [vmem:[#allocation11 + $0x420] sm:$0xff] }
  0xe3   :  { %2132 = vmatprep.subr.bf16.mxu1 %v3988_v57  ;;  %v4060_v43 = vcombine.high %v710_v40, %v714_v41  ;;  %v718_v44 = vld [vmem:[#allocation11 + $0x440] sm:$0xff]  ;;  %v4059_v46 = vcombine.low %v710_v40, %v714_v41 }
  0xe4   :  { %v722_v45 = vld [vmem:[#allocation11 + $0x460] sm:$0xff] }
  0xe5   :  { %v4068_v47 = vcombine.high %v718_v44, %v722_v45  ;;  %v726_v48 = vld [vmem:[#allocation11 + $0x480] sm:$0xff]  ;;  %v4067_v50 = vcombine.low %v718_v44, %v722_v45 }
  0xe6   :  { %2133 = vmatpush1.bf16.msra.mxu1 %v3987_v60  ;;  %v730_v49 = vld [vmem:[#allocation11 + $0x4a0] sm:$0xff] }
  0xe7   :  { %2134 = vmatprep.subr.bf16.mxu1 %v3996_v61  ;;  %v4076_v51 = vcombine.high %v726_v48, %v730_v49  ;;  %v734_v52 = vld [vmem:[#allocation11 + $0x4c0] sm:$0xff]  ;;  %v4075_v54 = vcombine.low %v726_v48, %v730_v49 }
  0xe8   :  { %v738_v53 = vld [vmem:[#allocation11 + $0x4e0] sm:$0xff] }
  0xe9   :  { %v4084_v55 = vcombine.high %v734_v52, %v738_v53  ;;  %v742_v56 = vld [vmem:[#allocation11 + $0x500] sm:$0xff]  ;;  %v4083_v58 = vcombine.low %v734_v52, %v738_v53 }
  0xea   :  { %2135 = vmatpush1.bf16.msra.mxu1 %v3995_v0  ;;  %v746_v57 = vld [vmem:[#allocation11 + $0x520] sm:$0xff] }
  0xeb   :  { %2136 = vmatprep.subr.bf16.mxu1 %v4004_v1  ;;  %v4092_v59 = vcombine.high %v742_v56, %v746_v57  ;;  %v750_v60 = vld [vmem:[#allocation11 + $0x540] sm:$0xff]  ;;  %v4091_v62 = vcombine.low %v742_v56, %v746_v57 }
  0xec   :  { %v754_v61 = vld [vmem:[#allocation11 + $0x560] sm:$0xff] }
  0xed   :  { %v4100_v63 = vcombine.high %v750_v60, %v754_v61  ;;  %v758_v0 = vld [vmem:[#allocation11 + $0x580] sm:$0xff]  ;;  %v4099_v2 = vcombine.low %v750_v60, %v754_v61 }
  0xee   :  { %2137 = vmatpush1.bf16.msra.mxu1 %v4003_v4  ;;  %v762_v1 = vld [vmem:[#allocation11 + $0x5a0] sm:$0xff] }
  0xef   :  { %2138 = vmatprep.subr.bf16.mxu1 %v4012_v5  ;;  %v4108_v3 = vcombine.high %v758_v0, %v762_v1  ;;  %v4107_v4 = vcombine.low %v758_v0, %v762_v1  ;;  %v694_v5 = vld [vmem:[#allocation11 + $0x380] sm:$0xff] }
  0xf0   :  { %v698_v6 = vld [vmem:[#allocation11 + $0x3a0] sm:$0xff] }
  0xf1   :  { %v4044_v7 = vcombine.high %v694_v5, %v698_v6  ;;  %v770_v10 = vld [vmem:[#allocation11 + $0x5e0] sm:$0xff] }
  0xf2   :  { %2139 = vmatpush1.bf16.msra.mxu1 %v4011_v8  ;;  %v4043_v8 = vcombine.low %v694_v5, %v698_v6  ;;  %v5233_v61 = vld [vmem:[%s5348_s5] sm:$0xf] }
  0xf3   :  { %2140 = vmatprep.subr.bf16.mxu1 %v4020_v9  ;;  %v766_v9 = vld [vmem:[#allocation11 + $0x5c0] sm:$0xff] }
  0xf4   :  { %v4116_v11 = vcombine.high %v766_v9, %v770_v10  ;;  %v4115_v14 = vcombine.low %v766_v9, %v770_v10  ;;  %v591_v9 = vld [vmem:[#allocation11 + $0x48] sm:$0xff] }
  0xf5   :  { %v595_v10 = vld [vmem:[#allocation11 + $0x68] sm:$0xff] }
  0xf6   :  { %2141 = vmatpush1.bf16.msra.mxu1 %v4019_v12  ;;  %v702_v12 = vld [vmem:[#allocation11 + $0x3c0] sm:$0xff] }
  0xf7   :  { %2142 = vmatprep.subr.bf16.mxu1 %v4028_v13  ;;  %v706_v13 = vld [vmem:[#allocation11 + $0x3e0] sm:$0xff] }
  0xf8   :  { %v4052_v15 = vcombine.high %v702_v12, %v706_v13 }
  0xfa   :  { %2143 = vmatpush1.bf16.msra.mxu1 %v4027_v16  ;;  %v4051_v16 = vcombine.low %v702_v12, %v706_v13  ;;  %v3942_v13 = vcombine.high %v591_v9, %v595_v10 }
  0xfb   :  { %2144 = vmatprep.subr.bf16.mxu1 %v4036_v17  ;;  %v774_v17 = vld [vmem:[#allocation11 + $0x600] sm:$0xff] }
  0xfe   :  { %2145 = vmatpush1.bf16.msra.mxu1 %v4035_v18  ;;  %v778_v18 = vld [vmem:[#allocation11 + $0x620] sm:$0xff] }
  0xff   :  { %2146 = vmatprep.subr.bf16.mxu1 %v4044_v7 }
 0x102   :  { %2147 = vmatpush1.bf16.msra.mxu1 %v4043_v8 }
 0x103   :  { %2148 = vmatprep.subr.bf16.mxu1 %v4052_v15  ;;  %v603_v15 = vld [vmem:[#allocation11 + $0xa8] sm:$0xff] }
 0x106   :  { %2149 = vmatpush1.bf16.msra.mxu1 %v4051_v16  ;;  %v3941_v16 = vcombine.low %v591_v9, %v595_v10 }
 0x198   :  { %v268_v20 = vpop.f32.mrb[0].mxu1 }
 0x199   :  { %v269_v21 = vadd.f32 %v3894_v19, %v268_v20  ;;  %v4373_v22 = vpop.f32.mrb[1].mxu1  ;;  %v4123_v19 = vcombine.low %v774_v17, %v778_v18  ;;  %v4124_v20 = vcombine.high %v774_v17, %v778_v18  ;;  %v607_v18 = vld [vmem:[#allocation11 + $0xc8] sm:$0xff] }
 0x19a   :  { %v5214_v22 = vld [vmem:[#allocation11 + $0x28] sm:$0xff] }
 0x19b   :  { %v272_v23 = vmax.f32 %v269_v21, 0.0  ;;  %v5212_v21 = vld [vmem:[#allocation11 + $0x8] sm:$0xff] }
 0x19d   :  { %v277_v25 = vpack.c.bf16 %v272_v23, %v272_v23  ;;  %v3934_v23 = vcombine.high %v5212_v21, %v5214_v22 }
 0x19f   :  { %525 = vmatmul.mubr.bf16.vlgmr.msra.gmra.mrb[0].mxu0 %v277_v25  ;;  %2200 = vmatprep.subr.bf16.mxu1 %v3934_v23 }
 0x1a0   :  { %534 = vmatpush1.bf16.msra.mxu0 %v4445_v24  ;;  %565 = vmatprep.mubr.bf16.mxu0 %v4986_v26  ;;  %v3933_v24 = vcombine.low %v5212_v21, %v5214_v22  ;;  %v627_v21 = vld [vmem:[#allocation11 + $0x168] sm:$0xff] }
 0x1a1   :  { %535 = vmatprep.subr.bf16.mxu0 %v4450_v27  ;;  %v786_v27 = vld [vmem:[#allocation11 + $0x660] sm:$0xff] }
 0x1a4   :  { %536 = vmatpush1.bf16.msra.mxu0 %v4448_v28 }
 0x1a5   :  { %537 = vmatprep.subr.bf16.mxu0 %v4453_v29 }
 0x1a8   :  { %538 = vmatpush1.bf16.msra.mxu0 %v4451_v30  ;;  %v790_v30 = vld [vmem:[#allocation11 + $0x680] sm:$0xff] }
 0x1a9   :  { %539 = vmatprep.subr.bf16.mxu0 %v4456_v31  ;;  %v794_v31 = vld [vmem:[#allocation11 + $0x6a0] sm:$0xff] }
 0x1ac   :  { %540 = vmatpush1.bf16.msra.mxu0 %v4454_v32  ;;  %v4139_v32 = vcombine.low %v790_v30, %v794_v31 }
 0x1ad   :  { %541 = vmatprep.subr.bf16.mxu0 %v4459_v33  ;;  %v4140_v33 = vcombine.high %v790_v30, %v794_v31  ;;  %v623_v30 = vld [vmem:[#allocation11 + $0x148] sm:$0xff] }
 0x1ae   :  { %v631_v31 = vld [vmem:[#allocation11 + $0x188] sm:$0xff] }
 0x1b0   :  { %542 = vmatpush1.bf16.msra.mxu0 %v4457_v34  ;;  %v798_v34 = vld [vmem:[#allocation11 + $0x6c0] sm:$0xff] }
 0x1b1   :  { %543 = vmatprep.subr.bf16.mxu0 %v4462_v35  ;;  %v802_v35 = vld [vmem:[#allocation11 + $0x6e0] sm:$0xff] }
 0x1b4   :  { %544 = vmatpush1.bf16.msra.mxu0 %v4460_v36  ;;  %v4147_v36 = vcombine.low %v798_v34, %v802_v35 }
 0x1b5   :  { %545 = vmatprep.subr.bf16.mxu0 %v4465_v37  ;;  %v4148_v37 = vcombine.high %v798_v34, %v802_v35  ;;  %v3973_v34 = vcombine.low %v623_v30, %v627_v21 }
 0x1b8   :  { %546 = vmatpush1.bf16.msra.mxu0 %v4463_v38  ;;  %v806_v38 = vld [vmem:[#allocation11 + $0x700] sm:$0xff] }
 0x1b9   :  { %547 = vmatprep.subr.bf16.mxu0 %v4468_v39  ;;  %v810_v39 = vld [vmem:[#allocation11 + $0x720] sm:$0xff] }
 0x1ba   :  { %v4155_v40 = vcombine.low %v806_v38, %v810_v39  ;;  %v4156_v41 = vcombine.high %v806_v38, %v810_v39  ;;  %v643_v38 = vld [vmem:[#allocation11 + $0x1e8] sm:$0xff] }
 0x1bc   :  { %548 = vmatpush1.bf16.msra.mxu0 %v4466_v42  ;;  %v814_v42 = vld [vmem:[#allocation11 + $0x740] sm:$0xff] }
 0x1bd   :  { %2159 = vmatprep.subr.bf16.mxu0 %v4060_v43  ;;  %v818_v43 = vld [vmem:[#allocation11 + $0x760] sm:$0xff] }
 0x1be   :  { %v4163_v44 = vcombine.low %v814_v42, %v818_v43  ;;  %v4164_v45 = vcombine.high %v814_v42, %v818_v43 }
 0x1bf   :  { %566 = vmatmul.mubr.bf16.vlgmr.msra.gmra.mrb[4].mxu0 %v277_v25  ;;  %v782_v25 = vld [vmem:[#allocation11 + $0x640] sm:$0xff] }
 0x1c0   :  { %2160 = vmatpush1.bf16.msra.mxu0 %v4059_v46  ;;  %v4131_v28 = vcombine.low %v782_v25, %v786_v27  ;;  %v4132_v29 = vcombine.high %v782_v25, %v786_v27  ;;  %v822_v46 = vld [vmem:[#allocation11 + $0x780] sm:$0xff]  ;;  %v615_v25 = vld [vmem:[#allocation11 + $0x108] sm:$0xff] }
 0x1c1   :  { %2161 = vmatprep.subr.bf16.mxu0 %v4068_v47  ;;  %v826_v47 = vld [vmem:[#allocation11 + $0x7a0] sm:$0xff]  ;;  %v619_v27 = vld [vmem:[#allocation11 + $0x128] sm:$0xff] }
 0x1c2   :  { %v4172_v48 = vcombine.high %v822_v46, %v826_v47  ;;  %v4171_v49 = vcombine.low %v822_v46, %v826_v47  ;;  %v3965_v22 = vcombine.low %v615_v25, %v619_v27 }
 0x1c4   :  { %2162 = vmatpush1.bf16.msra.mxu0 %v4067_v50  ;;  %v830_v50 = vld [vmem:[#allocation11 + $0x7c0] sm:$0xff] }
 0x1c5   :  { %2163 = vmatprep.subr.bf16.mxu0 %v4076_v51  ;;  %v834_v51 = vld [vmem:[#allocation11 + $0x7e0] sm:$0xff] }
 0x1c6   :  { %v4180_v52 = vcombine.high %v830_v50, %v834_v51  ;;  %v4179_v53 = vcombine.low %v830_v50, %v834_v51 }
 0x1c8   :  { %2164 = vmatpush1.bf16.msra.mxu0 %v4075_v54  ;;  %v5220_v54 = vld [vmem:[#allocation11 + $0x408] sm:$0xff] }
 0x1c9   :  { %2165 = vmatprep.subr.bf16.mxu0 %v4084_v55  ;;  %v5222_v55 = vld [vmem:[#allocation11 + $0x428] sm:$0xff] }
 0x1ca   :  { %v4062_v56 = vcombine.high %v5220_v54, %v5222_v55  ;;  %v4061_v57 = vcombine.low %v5220_v54, %v5222_v55 }
 0x1cc   :  { %2166 = vmatpush1.bf16.msra.mxu0 %v4083_v58  ;;  %v312_v58 = vlaneseq }
 0x1cd   :  { %2167 = vmatprep.subr.bf16.mxu0 %v4092_v59 }
 0x1ce   :  { %v313_v59 = vshrl.u32 %v312_v58, 7  ;;  %v719_v58 = vld [vmem:[#allocation11 + $0x448] sm:$0xff] }
 0x1d0   :  { %2168 = vmatpush1.bf16.msra.mxu0 %v4091_v62  ;;  %v5228_v60 = vsub.s32 0, %v313_v59  ;;  %v5235_v62 = vsub.s32 1, %v313_v59  ;;  %v5253_v35 = vsub.s32 3, %v313_v59 }
 0x1d1   :  { %2169 = vmatprep.subr.bf16.mxu0 %v4100_v63 }
 0x1d2   :  { %v315_v63 = vrot.slane %v5233_v61, %v5228_v60  ;;  %v319_v0 = vrot.slane %v5233_v61, %v5235_v62 }
 0x1d4   :  { %2170 = vmatpush1.bf16.msra.mxu0 %v4099_v2 }
 0x1d5   :  { %2171 = vmatprep.subr.bf16.mxu0 %v4108_v3 }
 0x1d8   :  { %2172 = vmatpush1.bf16.msra.mxu0 %v4107_v4 }
 0x1d9   :  { %2173 = vmatprep.subr.bf16.mxu0 %v4116_v11 }
 0x1dc   :  { %2174 = vmatpush1.bf16.msra.mxu0 %v4115_v14  ;;  %v599_v14 = vld [vmem:[#allocation11 + $0x88] sm:$0xff] }
 0x1dd   :  { %2175 = vmatprep.subr.bf16.mxu0 %v4124_v20  ;;  %v3950_v17 = vcombine.high %v599_v14, %v603_v15  ;;  %v3949_v20 = vcombine.low %v599_v14, %v603_v15  ;;  %v735_v15 = vld [vmem:[#allocation11 + $0x4c8] sm:$0xff] }
 0x1e0   :  { %2176 = vmatpush1.bf16.msra.mxu0 %v4123_v19  ;;  %v611_v19 = vld [vmem:[#allocation11 + $0xe8] sm:$0xff] }
 0x1e1   :  { %2177 = vmatprep.subr.bf16.mxu0 %v4132_v29  ;;  %v3958_v23 = vcombine.high %v607_v18, %v611_v19  ;;  %v3966_v29 = vcombine.high %v615_v25, %v619_v27  ;;  %v679_v25 = vld [vmem:[#allocation11 + $0x308] sm:$0xff] }
 0x1e2   :  { %v683_v27 = vld [vmem:[#allocation11 + $0x328] sm:$0xff] }
 0x1e4   :  { %2178 = vmatpush1.bf16.msra.mxu0 %v4131_v28  ;;  %v3957_v28 = vcombine.low %v607_v18, %v611_v19  ;;  %v675_v18 = vld [vmem:[#allocation11 + $0x2e8] sm:$0xff] }
 0x1e5   :  { %2179 = vmatprep.subr.bf16.mxu0 %v4140_v33  ;;  %v5251_v33 = vsub.s32 2, %v313_v59  ;;  %v723_v59 = vld [vmem:[#allocation11 + $0x468] sm:$0xff] }
 0x1e6   :  { %v4069_v9 = vcombine.low %v719_v58, %v723_v59 }
 0x1e7   :  { %v323_v39 = vrot.slane %v5233_v61, %v5251_v33 }
 0x1e8   :  { %2180 = vmatpush1.bf16.msra.mxu0 %v4139_v32  ;;  %v635_v32 = vld [vmem:[#allocation11 + $0x1a8] sm:$0xff] }
 0x1e9   :  { %2181 = vmatprep.subr.bf16.mxu0 %v4148_v37  ;;  %v639_v37 = vld [vmem:[#allocation11 + $0x1c8] sm:$0xff] }
 0x1ea   :  { %v3990_v42 = vcombine.high %v639_v37, %v643_v38  ;;  %v3989_v50 = vcombine.low %v639_v37, %v643_v38 }
 0x1ec   :  { %2182 = vmatpush1.bf16.msra.mxu0 %v4147_v36  ;;  %v3982_v36 = vcombine.high %v631_v31, %v635_v32 }
 0x1ed   :  { %2183 = vmatprep.subr.bf16.mxu0 %v4156_v41  ;;  %v3981_v41 = vcombine.low %v631_v31, %v635_v32  ;;  %v687_v31 = vld [vmem:[#allocation11 + $0x348] sm:$0xff] }
 0x1ee   :  { %v691_v32 = vld [vmem:[#allocation11 + $0x368] sm:$0xff] }
 0x1ef   :  { %v4038_v38 = vcombine.high %v687_v31, %v691_v32 }
 0x1f0   :  { %2184 = vmatpush1.bf16.msra.mxu0 %v4155_v40  ;;  %v327_v40 = vrot.slane %v5233_v61, %v5253_v35  ;;  %v655_v61 = vld [vmem:[#allocation11 + $0x248] sm:$0xff] }
 0x1f1   :  { %2185 = vmatprep.subr.bf16.mxu0 %v4164_v45  ;;  %v651_v45 = vld [vmem:[#allocation11 + $0x228] sm:$0xff] }
 0x1f4   :  { %2186 = vmatpush1.bf16.msra.mxu0 %v4163_v44  ;;  %v647_v44 = vld [vmem:[#allocation11 + $0x208] sm:$0xff] }
 0x1f5   :  { %2187 = vmatprep.subr.bf16.mxu0 %v4172_v48 }
 0x1f8   :  { %2188 = vmatpush1.bf16.msra.mxu0 %v4171_v49 }
 0x1f9   :  { %2189 = vmatprep.subr.bf16.mxu0 %v4180_v52 }
 0x1fc   :  { %2190 = vmatpush1.bf16.msra.mxu0 %v4179_v53  ;;  %v3998_v53 = vcombine.high %v647_v44, %v651_v45 }
 0x1fd   :  { %2241 = vmatprep.subr.bf16.mxu0 %v4062_v56 }
 0x272   :  { %v526_v1 = vpop.f32.mrb[0].mxu0 }
 0x273   :  { %v527_v2 = vadd.f32 %v526_v1, %v315_v63  ;;  %v528_v3 = vpop.f32.mrb[1].mxu0  ;;  %v659_v63 = vld [vmem:[#allocation11 + $0x268] sm:$0xff]  ;;  %v3997_v1 = vcombine.low %v647_v44, %v651_v45  ;;  %v4037_v44 = vcombine.low %v687_v31, %v691_v32  ;;  %v616_v32 = vld [vmem:[#allocation11 + $0x110] sm:$0xff] }
 0x274   :  { %v529_v4 = vadd.f32 %v528_v3, %v319_v0  ;;  %v530_v5 = vpop.f32.mrb[2].mxu0  ;;  %v4070_v3 = vcombine.high %v719_v58, %v723_v59  ;;  %v4005_v10 = vcombine.low %v655_v61, %v659_v63  ;;  %v775_v58 = vld [vmem:[#allocation11 + $0x608] sm:$0xff] }
 0x275   :  { %v574_v6 = vmax.f32 %v527_v2, 0.0  ;;  %v531_v7 = vpop.f32.mrb[3].mxu0  ;;  %v4006_v5 = vcombine.high %v655_v61, %v659_v63  ;;  %v779_v59 = vld [vmem:[#allocation11 + $0x628] sm:$0xff]  ;;  %v584_v61 = vld [vmem:[#allocation11 + $0x10] sm:$0xff] }
 0x276   :  { %v575_v8 = vmax.f32 %v529_v4, 0.0  ;;  %v727_v4 = vld [vmem:[#allocation11 + $0x488] sm:$0xff]  ;;  %v588_v63 = vld [vmem:[#allocation11 + $0x30] sm:$0xff] }
 0x277   :  { %v5243_v12 = vpack.c.bf16 %v574_v6, %v574_v6  ;;  %v731_v6 = vld [vmem:[#allocation11 + $0x4a8] sm:$0xff] }
 0x278   :  { %v5241_v11 = vpack.c.bf16 %v575_v8, %v575_v8  ;;  %v663_v7 = vld [vmem:[#allocation11 + $0x288] sm:$0xff]  ;;  %v4077_v19 = vcombine.low %v727_v4, %v731_v6 }
 0x279   :  { %v667_v8 = vld [vmem:[#allocation11 + $0x2a8] sm:$0xff] }
 0x27a   :  { %2150 = vmatprep.mubr.bf16.mxu1 %v5241_v11  ;;  %v4014_v14 = vcombine.high %v663_v7, %v667_v8  ;;  %v811_v31 = vld [vmem:[#allocation11 + $0x728] sm:$0xff] }
 0x27b   :  { %2151 = vmatmul.mubr.bf16.vlgmr.msra.gmra.mrb[4].mxu1 %v5243_v12 }
 0x27c   :  { %2201 = vmatpush1.bf16.msra.mxu1 %v3933_v24  ;;  %2232 = vmatprep.mubr.bf16.mxu1 %v5241_v11  ;;  %v3974_v24 = vcombine.high %v623_v30, %v627_v21  ;;  %v4030_v21 = vcombine.high %v679_v25, %v683_v27 }
 0x27d   :  { %2202 = vmatprep.subr.bf16.mxu1 %v3942_v13  ;;  %v4078_v13 = vcombine.high %v727_v4, %v731_v6  ;;  %v4126_v4 = vcombine.high %v775_v58, %v779_v59  ;;  %v783_v6 = vld [vmem:[#allocation11 + $0x648] sm:$0xff] }
 0x280   :  { %2203 = vmatpush1.bf16.msra.mxu1 %v3941_v16  ;;  %v739_v16 = vld [vmem:[#allocation11 + $0x4e8] sm:$0xff] }
 0x281   :  { %2204 = vmatprep.subr.bf16.mxu1 %v3950_v17  ;;  %v671_v17 = vld [vmem:[#allocation11 + $0x2c8] sm:$0xff]  ;;  %v4086_v54 = vcombine.high %v735_v15, %v739_v16 }
 0x282   :  { %v4022_v55 = vcombine.high %v671_v17, %v675_v18 }
 0x284   :  { %2205 = vmatpush1.bf16.msra.mxu1 %v3949_v20  ;;  %v4013_v20 = vcombine.low %v663_v7, %v667_v8  ;;  %v787_v7 = vld [vmem:[#allocation11 + $0x668] sm:$0xff]  ;;  %v592_v8 = vld [vmem:[#allocation11 + $0x50] sm:$0xff] }
 0x285   :  { %2206 = vmatprep.subr.bf16.mxu1 %v3958_v23  ;;  %v747_v23 = vld [vmem:[#allocation11 + $0x528] sm:$0xff] }
 0x288   :  { %2207 = vmatpush1.bf16.msra.mxu1 %v3957_v28  ;;  %v4085_v28 = vcombine.low %v735_v15, %v739_v16  ;;  %v791_v15 = vld [vmem:[#allocation11 + $0x688] sm:$0xff] }
 0x289   :  { %2208 = vmatprep.subr.bf16.mxu1 %v3966_v29  ;;  %v4021_v29 = vcombine.low %v671_v17, %v675_v18  ;;  %v795_v17 = vld [vmem:[#allocation11 + $0x6a8] sm:$0xff]  ;;  %v600_v18 = vld [vmem:[#allocation11 + $0x90] sm:$0xff] }
 0x28c   :  { %2209 = vmatpush1.bf16.msra.mxu1 %v3965_v22  ;;  %v751_v22 = vld [vmem:[#allocation11 + $0x548] sm:$0xff] }
 0x28d   :  { %2210 = vmatprep.subr.bf16.mxu1 %v3974_v24  ;;  %v755_v24 = vld [vmem:[#allocation11 + $0x568] sm:$0xff] }
 0x28e   :  { %v4102_v37 = vcombine.high %v751_v22, %v755_v24 }
 0x290   :  { %2211 = vmatpush1.bf16.msra.mxu1 %v3973_v34 }
 0x291   :  { %2212 = vmatprep.subr.bf16.mxu1 %v3982_v36  ;;  %v4029_v36 = vcombine.low %v679_v25, %v683_v27  ;;  %v803_v25 = vld [vmem:[#allocation11 + $0x6e8] sm:$0xff]  ;;  %v608_v27 = vld [vmem:[#allocation11 + $0xd0] sm:$0xff] }
 0x292   :  { %v567_v43 = vpop.f32.mrb[4].mxu0 }
 0x293   :  { %v568_v46 = vadd.f32 %v567_v43, %v323_v39  ;;  %v569_v47 = vpop.f32.mrb[5].mxu0  ;;  %v759_v39 = vld [vmem:[#allocation11 + $0x588] sm:$0xff]  ;;  %v4101_v43 = vcombine.low %v751_v22, %v755_v24 }
 0x294   :  { %v570_v48 = vadd.f32 %v569_v47, %v327_v40  ;;  %v571_v49 = vpop.f32.mrb[6].mxu0  ;;  %2213 = vmatpush1.bf16.msra.mxu1 %v3981_v41  ;;  %v763_v40 = vld [vmem:[#allocation11 + $0x5a8] sm:$0xff] }
 0x295   :  { %v576_v51 = vmax.f32 %v568_v46, 0.0  ;;  %v572_v52 = vpop.f32.mrb[7].mxu0  ;;  %2214 = vmatprep.subr.bf16.mxu1 %v3990_v42  ;;  %v695_v41 = vld [vmem:[#allocation11 + $0x388] sm:$0xff]  ;;  %v4110_v45 = vcombine.high %v759_v39, %v763_v40 }
 0x296   :  { %v577_v56 = vmax.f32 %v570_v48, 0.0  ;;  %v699_v42 = vld [vmem:[#allocation11 + $0x3a8] sm:$0xff] }
 0x297   :  { %v5261_v2 = vpack.c.bf16 %v576_v51, %v576_v51  ;;  %v4046_v46 = vcombine.high %v695_v41, %v699_v42  ;;  %v767_v47 = vld [vmem:[#allocation11 + $0x5c8] sm:$0xff]  ;;  %v4109_v51 = vcombine.low %v759_v39, %v763_v40  ;;  %v4045_v52 = vcombine.low %v695_v41, %v699_v42  ;;  %v624_v42 = vld [vmem:[#allocation11 + $0x150] sm:$0xff] }
 0x298   :  { %v5259_v0 = vpack.c.bf16 %v577_v56, %v577_v56  ;;  %2215 = vmatpush1.bf16.msra.mxu1 %v3989_v50  ;;  %v771_v48 = vld [vmem:[#allocation11 + $0x5e8] sm:$0xff] }
 0x299   :  { %2216 = vmatprep.subr.bf16.mxu1 %v3998_v53  ;;  %v703_v49 = vld [vmem:[#allocation11 + $0x3c8] sm:$0xff]  ;;  %v4118_v53 = vcombine.high %v767_v47, %v771_v48 }
 0x29a   :  { %2191 = vmatprep.mubr.bf16.mxu0 %v5259_v0  ;;  %v707_v50 = vld [vmem:[#allocation11 + $0x3e8] sm:$0xff] }
 0x29b   :  { %2192 = vmatmul.mubr.bf16.vlgmr.msra.gmra.mrb[8].mxu0 %v5261_v2  ;;  %v4054_v56 = vcombine.high %v703_v49, %v707_v50  ;;  %v807_v24 = vld [vmem:[#allocation11 + $0x708] sm:$0xff] }
 0x29c   :  { %2242 = vmatpush1.bf16.msra.mxu0 %v4061_v57  ;;  %2217 = vmatpush1.bf16.msra.mxu1 %v3997_v1  ;;  %v743_v57 = vld [vmem:[#allocation11 + $0x508] sm:$0xff]  ;;  %v4117_v1 = vcombine.low %v767_v47, %v771_v48 }
 0x29d   :  { %2273 = vmatprep.mubr.bf16.mxu0 %v5259_v0  ;;  %2243 = vmatprep.subr.bf16.mxu0 %v4070_v3  ;;  %v4094_v30 = vcombine.high %v743_v57, %v747_v23  ;;  %v4093_v34 = vcombine.low %v743_v57, %v747_v23  ;;  %v4053_v3 = vcombine.low %v703_v49, %v707_v50  ;;  %v799_v23 = vld [vmem:[#allocation11 + $0x6c8] sm:$0xff]  ;;  %v632_v50 = vld [vmem:[#allocation11 + $0x190] sm:$0xff] }
 0x29e   :  { %2218 = vmatprep.subr.bf16.mxu1 %v4006_v5  ;;  %v3936_v5 = vcombine.high %v584_v61, %v588_v63  ;;  %v815_v40 = vld [vmem:[#allocation11 + $0x748] sm:$0xff] }
 0x29f   :  { %v819_v41 = vld [vmem:[#allocation11 + $0x768] sm:$0xff] }
 0x2a0   :  { %2244 = vmatpush1.bf16.msra.mxu0 %v4069_v9  ;;  %2219 = vmatpush1.bf16.msra.mxu1 %v4005_v10  ;;  %v596_v9 = vld [vmem:[#allocation11 + $0x70] sm:$0xff]  ;;  %v4125_v10 = vcombine.low %v775_v58, %v779_v59  ;;  %v823_v48 = vld [vmem:[#allocation11 + $0x788] sm:$0xff] }
 0x2a1   :  { %2245 = vmatprep.subr.bf16.mxu0 %v4078_v13  ;;  %2220 = vmatprep.subr.bf16.mxu1 %v4014_v14  ;;  %v3935_v13 = vcombine.low %v584_v61, %v588_v63  ;;  %v4134_v14 = vcombine.high %v783_v6, %v787_v7  ;;  %v3944_v16 = vcombine.high %v592_v8, %v596_v9  ;;  %v827_v49 = vld [vmem:[#allocation11 + $0x7a8] sm:$0xff]  ;;  %v640_v63 = vld [vmem:[#allocation11 + $0x1d0] sm:$0xff] }
 0x2a2   :  { %v831_v59 = vld [vmem:[#allocation11 + $0x7c8] sm:$0xff] }
 0x2a3   :  { %v835_v61 = vld [vmem:[#allocation11 + $0x7e8] sm:$0xff] }
 0x2a4   :  { %2246 = vmatpush1.bf16.msra.mxu0 %v4077_v19  ;;  %2221 = vmatpush1.bf16.msra.mxu1 %v4013_v20  ;;  %v604_v19 = vld [vmem:[#allocation11 + $0xb0] sm:$0xff]  ;;  %v4133_v20 = vcombine.low %v783_v6, %v787_v7  ;;  %v585_v7 = vld [vmem:[#allocation11 + $0x18] sm:$0xff] }
 0x2a5   :  { %2247 = vmatprep.subr.bf16.mxu0 %v4086_v54  ;;  %2222 = vmatprep.subr.bf16.mxu1 %v4022_v55  ;;  %v3943_v54 = vcombine.low %v592_v8, %v596_v9  ;;  %v4142_v55 = vcombine.high %v791_v15, %v795_v17  ;;  %v3952_v57 = vcombine.high %v600_v18, %v604_v19  ;;  %v589_v8 = vld [vmem:[#allocation11 + $0x38] sm:$0xff]  ;;  %v648_v9 = vld [vmem:[#allocation11 + $0x210] sm:$0xff] }
 0x2a8   :  { %2248 = vmatpush1.bf16.msra.mxu0 %v4085_v28  ;;  %2223 = vmatpush1.bf16.msra.mxu1 %v4021_v29  ;;  %v612_v28 = vld [vmem:[#allocation11 + $0xf0] sm:$0xff]  ;;  %v4141_v29 = vcombine.low %v791_v15, %v795_v17  ;;  %v3938_v15 = vcombine.high %v585_v7, %v589_v8  ;;  %v593_v17 = vld [vmem:[#allocation11 + $0x58] sm:$0xff] }
 0x2a9   :  { %2249 = vmatprep.subr.bf16.mxu0 %v4094_v30  ;;  %2224 = vmatprep.subr.bf16.mxu1 %v4030_v21  ;;  %v3951_v30 = vcombine.low %v600_v18, %v604_v19  ;;  %v4150_v21 = vcombine.high %v799_v23, %v803_v25  ;;  %v3960_v22 = vcombine.high %v608_v27, %v612_v28  ;;  %v597_v18 = vld [vmem:[#allocation11 + $0x78] sm:$0xff]  ;;  %v656_v19 = vld [vmem:[#allocation11 + $0x250] sm:$0xff] }
 0x2ac   :  { %2250 = vmatpush1.bf16.msra.mxu0 %v4093_v34  ;;  %2225 = vmatpush1.bf16.msra.mxu1 %v4029_v36  ;;  %v620_v34 = vld [vmem:[#allocation11 + $0x130] sm:$0xff]  ;;  %v4149_v36 = vcombine.low %v799_v23, %v803_v25  ;;  %v601_v25 = vld [vmem:[#allocation11 + $0x98] sm:$0xff] }
 0x2ad   :  { %2251 = vmatprep.subr.bf16.mxu0 %v4102_v37  ;;  %2226 = vmatprep.subr.bf16.mxu1 %v4038_v38  ;;  %v3959_v37 = vcombine.low %v608_v27, %v612_v28  ;;  %v4158_v38 = vcombine.high %v807_v24, %v811_v31  ;;  %v3968_v39 = vcombine.high %v616_v32, %v620_v34  ;;  %v605_v27 = vld [vmem:[#allocation11 + $0xb8] sm:$0xff]  ;;  %v664_v28 = vld [vmem:[#allocation11 + $0x290] sm:$0xff] }
 0x2b0   :  { %2252 = vmatpush1.bf16.msra.mxu0 %v4101_v43  ;;  %2227 = vmatpush1.bf16.msra.mxu1 %v4037_v44  ;;  %v628_v43 = vld [vmem:[#allocation11 + $0x170] sm:$0xff]  ;;  %v4157_v44 = vcombine.low %v807_v24, %v811_v31  ;;  %v609_v31 = vld [vmem:[#allocation11 + $0xd8] sm:$0xff] }
 0x2b1   :  { %2253 = vmatprep.subr.bf16.mxu0 %v4110_v45  ;;  %2228 = vmatprep.subr.bf16.mxu1 %v4046_v46  ;;  %v3967_v45 = vcombine.low %v616_v32, %v620_v34  ;;  %v4166_v46 = vcombine.high %v815_v40, %v819_v41  ;;  %v3976_v47 = vcombine.high %v624_v42, %v628_v43  ;;  %v613_v32 = vld [vmem:[#allocation11 + $0xf8] sm:$0xff]  ;;  %v672_v34 = vld [vmem:[#allocation11 + $0x2d0] sm:$0xff] }
 0x2b4   :  { %2254 = vmatpush1.bf16.msra.mxu0 %v4109_v51  ;;  %2229 = vmatpush1.bf16.msra.mxu1 %v4045_v52  ;;  %v636_v51 = vld [vmem:[#allocation11 + $0x1b0] sm:$0xff]  ;;  %v4165_v52 = vcombine.low %v815_v40, %v819_v41  ;;  %v621_v41 = vld [vmem:[#allocation11 + $0x138] sm:$0xff] }
 0x2b5   :  { %2255 = vmatprep.subr.bf16.mxu0 %v4118_v53  ;;  %2230 = vmatprep.subr.bf16.mxu1 %v4054_v56  ;;  %v3975_v53 = vcombine.low %v624_v42, %v628_v43  ;;  %v4174_v56 = vcombine.high %v823_v48, %v827_v49  ;;  %v3984_v58 = vcombine.high %v632_v50, %v636_v51  ;;  %v680_v42 = vld [vmem:[#allocation11 + $0x310] sm:$0xff] }
 0x2b6   :  { %v684_v43 = vld [vmem:[#allocation11 + $0x330] sm:$0xff] }
 0x2b8   :  { %2256 = vmatpush1.bf16.msra.mxu0 %v4117_v1  ;;  %2231 = vmatpush1.bf16.msra.mxu1 %v4053_v3  ;;  %v644_v1 = vld [vmem:[#allocation11 + $0x1f0] sm:$0xff]  ;;  %v4173_v3 = vcombine.low %v823_v48, %v827_v49  ;;  %v625_v48 = vld [vmem:[#allocation11 + $0x158] sm:$0xff] }
 0x2b9   :  { %2257 = vmatprep.subr.bf16.mxu0 %v4126_v4  ;;  %2282 = vmatprep.subr.bf16.mxu1 %v3936_v5  ;;  %v3983_v4 = vcombine.low %v632_v50, %v636_v51  ;;  %v4182_v5 = vcombine.high %v831_v59, %v835_v61  ;;  %v3992_v6 = vcombine.high %v640_v63, %v644_v1  ;;  %v629_v49 = vld [vmem:[#allocation11 + $0x178] sm:$0xff]  ;;  %v688_v50 = vld [vmem:[#allocation11 + $0x350] sm:$0xff] }
 0x2ba   :  { %v692_v51 = vld [vmem:[#allocation11 + $0x370] sm:$0xff] }
 0x2bb   :  { %2233 = vmatmul.mubr.bf16.vlgmr.msra.gmra.mrb[8].mxu1 %v5243_v12 }
 0x2bc   :  { %2258 = vmatpush1.bf16.msra.mxu0 %v4125_v10  ;;  %2283 = vmatpush1.bf16.msra.mxu1 %v3935_v13  ;;  %v652_v10 = vld [vmem:[#allocation11 + $0x230] sm:$0xff]  ;;  %v4181_v13 = vcombine.low %v831_v59, %v835_v61  ;;  %v633_v59 = vld [vmem:[#allocation11 + $0x198] sm:$0xff] }
 0x2bd   :  { %2314 = vmatprep.mubr.bf16.mxu1 %v5241_v11  ;;  %2259 = vmatprep.subr.bf16.mxu0 %v4134_v14  ;;  %v3991_v14 = vcombine.low %v640_v63, %v644_v1  ;;  %v637_v61 = vld [vmem:[#allocation11 + $0x1b8] sm:$0xff]  ;;  %v696_v63 = vld [vmem:[#allocation11 + $0x390] sm:$0xff] }
 0x2be   :  { %2284 = vmatprep.subr.bf16.mxu1 %v3944_v16  ;;  %v4000_v16 = vcombine.high %v648_v9, %v652_v10  ;;  %v700_v1 = vld [vmem:[#allocation11 + $0x3b0] sm:$0xff] }
 0x2c0   :  { %2260 = vmatpush1.bf16.msra.mxu0 %v4133_v20  ;;  %2285 = vmatpush1.bf16.msra.mxu1 %v3943_v54  ;;  %v660_v20 = vld [vmem:[#allocation11 + $0x270] sm:$0xff]  ;;  %v3937_v54 = vcombine.low %v585_v7, %v589_v8  ;;  %v641_v7 = vld [vmem:[#allocation11 + $0x1d8] sm:$0xff] }
 0x2c1   :  { %2261 = vmatprep.subr.bf16.mxu0 %v4142_v55  ;;  %2286 = vmatprep.subr.bf16.mxu1 %v3952_v57  ;;  %v3999_v55 = vcombine.low %v648_v9, %v652_v10  ;;  %v3946_v57 = vcombine.high %v593_v17, %v597_v18  ;;  %v4008_v23 = vcombine.high %v656_v19, %v660_v20  ;;  %v645_v8 = vld [vmem:[#allocation11 + $0x1f8] sm:$0xff]  ;;  %v704_v9 = vld [vmem:[#allocation11 + $0x3d0] sm:$0xff] }
 0x2c2   :  { %v708_v10 = vld [vmem:[#allocation11 + $0x3f0] sm:$0xff] }
 0x2c4   :  { %2262 = vmatpush1.bf16.msra.mxu0 %v4141_v29  ;;  %2287 = vmatpush1.bf16.msra.mxu1 %v3951_v30  ;;  %v668_v29 = vld [vmem:[#allocation11 + $0x2b0] sm:$0xff]  ;;  %v3945_v30 = vcombine.low %v593_v17, %v597_v18  ;;  %v649_v17 = vld [vmem:[#allocation11 + $0x218] sm:$0xff] }
 0x2c5   :  { %2263 = vmatprep.subr.bf16.mxu0 %v4150_v21  ;;  %2288 = vmatprep.subr.bf16.mxu1 %v3960_v22  ;;  %v4007_v21 = vcombine.low %v656_v19, %v660_v20  ;;  %v3954_v22 = vcombine.high %v601_v25, %v605_v27  ;;  %v4016_v24 = vcombine.high %v664_v28, %v668_v29  ;;  %v653_v18 = vld [vmem:[#allocation11 + $0x238] sm:$0xff]  ;;  %v712_v19 = vld [vmem:[#allocation11 + $0x410] sm:$0xff] }
 0x2c6   :  { %v716_v20 = vld [vmem:[#allocation11 + $0x430] sm:$0xff] }
 0x2c8   :  { %2264 = vmatpush1.bf16.msra.mxu0 %v4149_v36  ;;  %2289 = vmatpush1.bf16.msra.mxu1 %v3959_v37  ;;  %v676_v36 = vld [vmem:[#allocation11 + $0x2f0] sm:$0xff]  ;;  %v3953_v37 = vcombine.low %v601_v25, %v605_v27  ;;  %v657_v25 = vld [vmem:[#allocation11 + $0x258] sm:$0xff] }
 0x2c9   :  { %2265 = vmatprep.subr.bf16.mxu0 %v4158_v38  ;;  %2290 = vmatprep.subr.bf16.mxu1 %v3968_v39  ;;  %v4015_v38 = vcombine.low %v664_v28, %v668_v29  ;;  %v3962_v39 = vcombine.high %v609_v31, %v613_v32  ;;  %v4024_v40 = vcombine.high %v672_v34, %v676_v36  ;;  %v661_v27 = vld [vmem:[#allocation11 + $0x278] sm:$0xff]  ;;  %v720_v28 = vld [vmem:[#allocation11 + $0x450] sm:$0xff] }
 0x2ca   :  { %v724_v29 = vld [vmem:[#allocation11 + $0x470] sm:$0xff] }
 0x2cc   :  { %2266 = vmatpush1.bf16.msra.mxu0 %v4157_v44  ;;  %2291 = vmatpush1.bf16.msra.mxu1 %v3967_v45  ;;  %v3961_v44 = vcombine.low %v609_v31, %v613_v32  ;;  %v4023_v45 = vcombine.low %v672_v34, %v676_v36  ;;  %v665_v31 = vld [vmem:[#allocation11 + $0x298] sm:$0xff]  ;;  %v728_v34 = vld [vmem:[#allocation11 + $0x490] sm:$0xff] }
 0x2cd   :  { %2267 = vmatprep.subr.bf16.mxu0 %v4166_v46  ;;  %2292 = vmatprep.subr.bf16.mxu1 %v3976_v47  ;;  %v4032_v47 = vcombine.high %v680_v42, %v684_v43  ;;  %v669_v32 = vld [vmem:[#allocation11 + $0x2b8] sm:$0xff]  ;;  %v732_v36 = vld [vmem:[#allocation11 + $0x4b0] sm:$0xff] }
 0x2d0   :  { %2268 = vmatpush1.bf16.msra.mxu0 %v4165_v52  ;;  %2293 = vmatpush1.bf16.msra.mxu1 %v3975_v53  ;;  %v4031_v53 = vcombine.low %v680_v42, %v684_v43  ;;  %v736_v42 = vld [vmem:[#allocation11 + $0x4d0] sm:$0xff] }
 0x2d1   :  { %2269 = vmatprep.subr.bf16.mxu0 %v4174_v56  ;;  %2294 = vmatprep.subr.bf16.mxu1 %v3984_v58  ;;  %v3978_v56 = vcombine.high %v625_v48, %v629_v49  ;;  %v4040_v58 = vcombine.high %v688_v50, %v692_v51  ;;  %v740_v43 = vld [vmem:[#allocation11 + $0x4f0] sm:$0xff] }
 0x2d4   :  { %2270 = vmatpush1.bf16.msra.mxu0 %v4173_v3  ;;  %2295 = vmatpush1.bf16.msra.mxu1 %v3983_v4  ;;  %v3977_v3 = vcombine.low %v625_v48, %v629_v49  ;;  %v4039_v4 = vcombine.low %v688_v50, %v692_v51  ;;  %v681_v48 = vld [vmem:[#allocation11 + $0x318] sm:$0xff]  ;;  %v744_v50 = vld [vmem:[#allocation11 + $0x510] sm:$0xff] }
 0x2d5   :  { %2271 = vmatprep.subr.bf16.mxu0 %v4182_v5  ;;  %2296 = vmatprep.subr.bf16.mxu1 %v3992_v6  ;;  %v3986_v5 = vcombine.high %v633_v59, %v637_v61  ;;  %v4048_v6 = vcombine.high %v696_v63, %v700_v1  ;;  %v685_v49 = vld [vmem:[#allocation11 + $0x338] sm:$0xff]  ;;  %v748_v51 = vld [vmem:[#allocation11 + $0x530] sm:$0xff] }
 0x2d8   :  { %2272 = vmatpush1.bf16.msra.mxu0 %v4181_v13  ;;  %2297 = vmatpush1.bf16.msra.mxu1 %v3991_v14  ;;  %v3985_v13 = vcombine.low %v633_v59, %v637_v61  ;;  %v4047_v14 = vcombine.low %v696_v63, %v700_v1  ;;  %v689_v59 = vld [vmem:[#allocation11 + $0x358] sm:$0xff]  ;;  %v752_v63 = vld [vmem:[#allocation11 + $0x550] sm:$0xff] }
 0x2d9   :  { %2364 = vmatprep.subr.bf16.mxu0 %v3938_v15  ;;  %2298 = vmatprep.subr.bf16.mxu1 %v4000_v16  ;;  %v3994_v15 = vcombine.high %v641_v7, %v645_v8  ;;  %v4056_v16 = vcombine.high %v704_v9, %v708_v10  ;;  %v693_v61 = vld [vmem:[#allocation11 + $0x378] sm:$0xff]  ;;  %v756_v1 = vld [vmem:[#allocation11 + $0x570] sm:$0xff] }
 0x2db   :  { %2274 = vmatmul.mubr.bf16.vlgmr.msra.gmra.mrb[12].mxu0 %v5261_v2 }
 0x2dc   :  { %2365 = vmatpush1.bf16.msra.mxu0 %v3937_v54  ;;  %2396 = vmatprep.mubr.bf16.mxu0 %v5241_v11  ;;  %v617_v11 = vld [vmem:[#allocation11 + $0x118] sm:$0xff]  ;;  %v3993_v54 = vcombine.low %v641_v7, %v645_v8 }
 0x2dd   :  { %2299 = vmatpush1.bf16.msra.mxu1 %v3999_v55  ;;  %2366 = vmatprep.subr.bf16.mxu0 %v3946_v57  ;;  %v3970_v46 = vcombine.high %v617_v11, %v621_v41  ;;  %v3969_v52 = vcombine.low %v617_v11, %v621_v41  ;;  %v4055_v55 = vcombine.low %v704_v9, %v708_v10  ;;  %v673_v11 = vld [vmem:[#allocation11 + $0x2d8] sm:$0xff]  ;;  %v760_v9 = vld [vmem:[#allocation11 + $0x590] sm:$0xff] }
 0x2de   :  { %2300 = vmatprep.subr.bf16.mxu1 %v4008_v23  ;;  %v4002_v57 = vcombine.high %v649_v17, %v653_v18  ;;  %v4064_v23 = vcombine.high %v712_v19, %v716_v20  ;;  %v677_v41 = vld [vmem:[#allocation11 + $0x2f8] sm:$0xff]  ;;  %v764_v10 = vld [vmem:[#allocation11 + $0x5b0] sm:$0xff] }
 0x2df   :  { %v697_v7 = vld [vmem:[#allocation11 + $0x398] sm:$0xff] }
 0x2e0   :  { %2367 = vmatpush1.bf16.msra.mxu0 %v3945_v30  ;;  %v4001_v30 = vcombine.low %v649_v17, %v653_v18  ;;  %v701_v8 = vld [vmem:[#allocation11 + $0x3b8] sm:$0xff] }
 0x2e1   :  { %2301 = vmatpush1.bf16.msra.mxu1 %v4007_v21  ;;  %2368 = vmatprep.subr.bf16.mxu0 %v3954_v22  ;;  %v4063_v21 = vcombine.low %v712_v19, %v716_v20  ;;  %v4010_v22 = vcombine.high %v657_v25, %v661_v27  ;;  %v705_v17 = vld [vmem:[#allocation11 + $0x3d8] sm:$0xff]  ;;  %v768_v19 = vld [vmem:[#allocation11 + $0x5d0] sm:$0xff] }
 0x2e2   :  { %2302 = vmatprep.subr.bf16.mxu1 %v4016_v24  ;;  %v4072_v24 = vcombine.high %v720_v28, %v724_v29  ;;  %v709_v18 = vld [vmem:[#allocation11 + $0x3f8] sm:$0xff]  ;;  %v772_v20 = vld [vmem:[#allocation11 + $0x5f0] sm:$0xff] }
 0x2e4   :  { %2369 = vmatpush1.bf16.msra.mxu0 %v3953_v37  ;;  %v4009_v37 = vcombine.low %v657_v25, %v661_v27  ;;  %v713_v25 = vld [vmem:[#allocation11 + $0x418] sm:$0xff] }
 0x2e5   :  { %2303 = vmatpush1.bf16.msra.mxu1 %v4015_v38  ;;  %2370 = vmatprep.subr.bf16.mxu0 %v3962_v39  ;;  %v4071_v38 = vcombine.low %v720_v28, %v724_v29  ;;  %v4018_v39 = vcombine.high %v665_v31, %v669_v32  ;;  %v717_v27 = vld [vmem:[#allocation11 + $0x438] sm:$0xff]  ;;  %v776_v28 = vld [vmem:[#allocation11 + $0x610] sm:$0xff] }
 0x2e6   :  { %2304 = vmatprep.subr.bf16.mxu1 %v4024_v40  ;;  %v4080_v40 = vcombine.high %v728_v34, %v732_v36  ;;  %v780_v29 = vld [vmem:[#allocation11 + $0x630] sm:$0xff] }
 0x2e8   :  { %2371 = vmatpush1.bf16.msra.mxu0 %v3961_v44  ;;  %v4017_v44 = vcombine.low %v665_v31, %v669_v32  ;;  %v721_v31 = vld [vmem:[#allocation11 + $0x458] sm:$0xff] }
 0x2e9   :  { %2305 = vmatpush1.bf16.msra.mxu1 %v4023_v45  ;;  %2372 = vmatprep.subr.bf16.mxu0 %v3970_v46  ;;  %v4079_v45 = vcombine.low %v728_v34, %v732_v36  ;;  %v4026_v46 = vcombine.high %v673_v11, %v677_v41  ;;  %v725_v32 = vld [vmem:[#allocation11 + $0x478] sm:$0xff]  ;;  %v784_v34 = vld [vmem:[#allocation11 + $0x650] sm:$0xff] }
 0x2ea   :  { %2306 = vmatprep.subr.bf16.mxu1 %v4032_v47  ;;  %v4088_v47 = vcombine.high %v736_v42, %v740_v43  ;;  %v788_v36 = vld [vmem:[#allocation11 + $0x670] sm:$0xff] }
 0x2ec   :  { %2373 = vmatpush1.bf16.msra.mxu0 %v3969_v52  ;;  %v4025_v52 = vcombine.low %v673_v11, %v677_v41  ;;  %v729_v11 = vld [vmem:[#allocation11 + $0x498] sm:$0xff] }
 0x2ed   :  { %2307 = vmatpush1.bf16.msra.mxu1 %v4031_v53  ;;  %2374 = vmatprep.subr.bf16.mxu0 %v3978_v56  ;;  %v4087_v53 = vcombine.low %v736_v42, %v740_v43  ;;  %v4034_v56 = vcombine.high %v681_v48, %v685_v49  ;;  %v733_v41 = vld [vmem:[#allocation11 + $0x4b8] sm:$0xff]  ;;  %v792_v42 = vld [vmem:[#allocation11 + $0x690] sm:$0xff] }
 0x2ee   :  { %2308 = vmatprep.subr.bf16.mxu1 %v4040_v58  ;;  %v4096_v58 = vcombine.high %v744_v50, %v748_v51  ;;  %v796_v43 = vld [vmem:[#allocation11 + $0x6b0] sm:$0xff] }
 0x2f0   :  { %2375 = vmatpush1.bf16.msra.mxu0 %v3977_v3  ;;  %v4033_v3 = vcombine.low %v681_v48, %v685_v49  ;;  %v737_v48 = vld [vmem:[#allocation11 + $0x4d8] sm:$0xff] }
 0x2f1   :  { %2309 = vmatpush1.bf16.msra.mxu1 %v4039_v4  ;;  %2376 = vmatprep.subr.bf16.mxu0 %v3986_v5  ;;  %v4095_v4 = vcombine.low %v744_v50, %v748_v51  ;;  %v4042_v5 = vcombine.high %v689_v59, %v693_v61  ;;  %v741_v49 = vld [vmem:[#allocation11 + $0x4f8] sm:$0xff]  ;;  %v800_v50 = vld [vmem:[#allocation11 + $0x6d0] sm:$0xff] }
 0x2f2   :  { %2310 = vmatprep.subr.bf16.mxu1 %v4048_v6  ;;  %v4104_v6 = vcombine.high %v752_v63, %v756_v1  ;;  %v804_v51 = vld [vmem:[#allocation11 + $0x6f0] sm:$0xff] }
 0x2f4   :  { %2377 = vmatpush1.bf16.msra.mxu0 %v3985_v13  ;;  %v4041_v13 = vcombine.low %v689_v59, %v693_v61  ;;  %v808_v59 = vld [vmem:[#allocation11 + $0x710] sm:$0xff] }
 0x2f5   :  { %2311 = vmatpush1.bf16.msra.mxu1 %v4047_v14  ;;  %2378 = vmatprep.subr.bf16.mxu0 %v3994_v15  ;;  %v4103_v14 = vcombine.low %v752_v63, %v756_v1  ;;  %v4050_v15 = vcombine.high %v697_v7, %v701_v8  ;;  %v812_v61 = vld [vmem:[#allocation11 + $0x730] sm:$0xff]  ;;  %v4089_v63 = vcombine.low %v737_v48, %v741_v49 }
 0x2f6   :  { %2312 = vmatprep.subr.bf16.mxu1 %v4056_v16  ;;  %v4112_v16 = vcombine.high %v760_v9, %v764_v10  ;;  %v4151_v1 = vcombine.low %v800_v50, %v804_v51 }
 0x2f8   :  { %2379 = vmatpush1.bf16.msra.mxu0 %v3993_v54  ;;  %v4049_v54 = vcombine.low %v697_v7, %v701_v8  ;;  %v816_v7 = vld [vmem:[#allocation11 + $0x750] sm:$0xff] }
 0x2f9   :  { %2313 = vmatpush1.bf16.msra.mxu1 %v4055_v55  ;;  %2380 = vmatprep.subr.bf16.mxu0 %v4002_v57  ;;  %v4111_v55 = vcombine.low %v760_v9, %v764_v10  ;;  %v4058_v57 = vcombine.high %v705_v17, %v709_v18  ;;  %v820_v8 = vld [vmem:[#allocation11 + $0x770] sm:$0xff]  ;;  %v4159_v10 = vcombine.low %v808_v59, %v812_v61 }
 0x2fa   :  { %2323 = vmatprep.subr.bf16.mxu1 %v4064_v23  ;;  %v4120_v23 = vcombine.high %v768_v19, %v772_v20 }
 0x2fc   :  { %2315 = vmatmul.mubr.bf16.vlgmr.msra.gmra.mrb[12].mxu1 %v5243_v12  ;;  %2381 = vmatpush1.bf16.msra.mxu0 %v4001_v30  ;;  %v4057_v30 = vcombine.low %v705_v17, %v709_v18  ;;  %v824_v17 = vld [vmem:[#allocation11 + $0x790] sm:$0xff] }
 0x2fd   :  { %2324 = vmatpush1.bf16.msra.mxu1 %v4063_v21  ;;  %2355 = vmatprep.mubr.bf16.mxu1 %v5259_v0  ;;  %v4119_v21 = vcombine.low %v768_v19, %v772_v20  ;;  %v828_v18 = vld [vmem:[#allocation11 + $0x7b0] sm:$0xff]  ;;  %v4167_v20 = vcombine.low %v816_v7, %v820_v8 }
 0x2fe   :  { %2382 = vmatprep.subr.bf16.mxu0 %v4010_v22  ;;  %2325 = vmatprep.subr.bf16.mxu1 %v4072_v24  ;;  %v4066_v22 = vcombine.high %v713_v25, %v717_v27  ;;  %v4128_v24 = vcombine.high %v776_v28, %v780_v29 }
 0x300   :  { %2383 = vmatpush1.bf16.msra.mxu0 %v4009_v37  ;;  %v4065_v37 = vcombine.low %v713_v25, %v717_v27  ;;  %v832_v25 = vld [vmem:[#allocation11 + $0x7d0] sm:$0xff] }
 0x301   :  { %2326 = vmatpush1.bf16.msra.mxu1 %v4071_v38  ;;  %2384 = vmatprep.subr.bf16.mxu0 %v4018_v39  ;;  %v4127_v38 = vcombine.low %v776_v28, %v780_v29  ;;  %v4074_v39 = vcombine.high %v721_v31, %v725_v32  ;;  %v836_v27 = vld [vmem:[#allocation11 + $0x7f0] sm:$0xff]  ;;  %v4175_v29 = vcombine.low %v824_v17, %v828_v18 }
 0x302   :  { %2327 = vmatprep.subr.bf16.mxu1 %v4080_v40  ;;  %v4136_v40 = vcombine.high %v784_v34, %v788_v36 }
 0x304   :  { %2385 = vmatpush1.bf16.msra.mxu0 %v4017_v44  ;;  %v4073_v44 = vcombine.low %v721_v31, %v725_v32  ;;  %v4183_v32 = vcombine.low %v832_v25, %v836_v27 }
 0x305   :  { %2328 = vmatpush1.bf16.msra.mxu1 %v4079_v45  ;;  %2386 = vmatprep.subr.bf16.mxu0 %v4026_v46  ;;  %v4135_v45 = vcombine.low %v784_v34, %v788_v36  ;;  %v4082_v46 = vcombine.high %v729_v11, %v733_v41  ;;  %v4471_v36 = vld [vmem:[#allocation12 + $0x4] ss:$8 sps:$4 sm:$0xff]  }
 0x306   :  { %2329 = vmatprep.subr.bf16.mxu1 %v4088_v47  ;;  %v4144_v47 = vcombine.high %v792_v42, %v796_v43 }
 0x308   :  { %2387 = vmatpush1.bf16.msra.mxu0 %v4025_v52  ;;  %v4081_v52 = vcombine.low %v729_v11, %v733_v41  ;;  %v4474_v41 = vld [vmem:[#allocation12 + $0x14] ss:$8 sps:$4 sm:$0xff]  }
 0x309   :  { %2330 = vmatpush1.bf16.msra.mxu1 %v4087_v53  ;;  %2388 = vmatprep.subr.bf16.mxu0 %v4034_v56  ;;  %v4090_v53 = vcombine.high %v737_v48, %v741_v49  ;;  %v4152_v56 = vcombine.high %v800_v50, %v804_v51  ;;  %v801_v48 = vld [vmem:[#allocation11 + $0x6d8] sm:$0xff]  ;;  %v4475_v51 = vld [vmem:[#allocation12 + $0x20] ss:$8 sps:$4 sm:$0xff]  }
 0x30a   :  { %2331 = vmatprep.subr.bf16.mxu1 %v4096_v58  ;;  %v749_v58 = vld [vmem:[#allocation11 + $0x538] sm:$0xff] }
 0x30b   :  { %v805_v49 = vld [vmem:[#allocation11 + $0x6f8] sm:$0xff] }
 0x30c   :  { %2389 = vmatpush1.bf16.msra.mxu0 %v4033_v3 }
 0x30d   :  { %2332 = vmatpush1.bf16.msra.mxu1 %v4095_v4  ;;  %2390 = vmatprep.subr.bf16.mxu0 %v4042_v5  ;;  %v4160_v4 = vcombine.high %v808_v59, %v812_v61  ;;  %v753_v5 = vld [vmem:[#allocation11 + $0x558] sm:$0xff]  ;;  %v4483_v61 = vld [vmem:[#allocation12 + $0x44] ss:$8 sps:$4 sm:$0xff]  }
 0x30e   :  { %2333 = vmatprep.subr.bf16.mxu1 %v4104_v6  ;;  %v757_v6 = vld [vmem:[#allocation11 + $0x578] sm:$0xff] }
 0x30f   :  { %v4105_v19 = vcombine.low %v753_v5, %v757_v6 }
 0x310   :  { %2391 = vmatpush1.bf16.msra.mxu0 %v4041_v13  ;;  %v4106_v13 = vcombine.high %v753_v5, %v757_v6  ;;  %v4486_v6 = vld [vmem:[#allocation12 + $0x54] ss:$8 sps:$4 sm:$0xff]  }
 0x311   :  { %2334 = vmatpush1.bf16.msra.mxu1 %v4103_v14  ;;  %2392 = vmatprep.subr.bf16.mxu0 %v4050_v15  ;;  %v4168_v14 = vcombine.high %v816_v7, %v820_v8  ;;  %v761_v15 = vld [vmem:[#allocation11 + $0x598] sm:$0xff] }
 0x312   :  { %2335 = vmatprep.subr.bf16.mxu1 %v4112_v16  ;;  %v765_v16 = vld [vmem:[#allocation11 + $0x5b8] sm:$0xff] }
 0x313   :  { %v4113_v28 = vcombine.low %v761_v15, %v765_v16  ;;  %v825_v7 = vld [vmem:[#allocation11 + $0x798] sm:$0xff] }
 0x314   :  { %2393 = vmatpush1.bf16.msra.mxu0 %v4049_v54  ;;  %v4114_v54 = vcombine.high %v761_v15, %v765_v16  ;;  %v829_v8 = vld [vmem:[#allocation11 + $0x7b8] sm:$0xff]  ;;  %v4489_v15 = vld [vmem:[#allocation12 + $0x64] ss:$8 sps:$4 sm:$0xff]  }
 0x315   :  { %2336 = vmatpush1.bf16.msra.mxu1 %v4111_v55  ;;  %2394 = vmatprep.subr.bf16.mxu0 %v4058_v57  ;;  %v4176_v55 = vcombine.high %v824_v17, %v828_v18  ;;  %v769_v57 = vld [vmem:[#allocation11 + $0x5d8] sm:$0xff] }
 0x316   :  { %2337 = vmatprep.subr.bf16.mxu1 %v4120_v23  ;;  %v773_v23 = vld [vmem:[#allocation11 + $0x5f8] sm:$0xff] }
 0x317   :  { %v4121_v31 = vcombine.low %v769_v57, %v773_v23  ;;  %v833_v16 = vld [vmem:[#allocation11 + $0x7d8] sm:$0xff] }
 0x318   :  { %2395 = vmatpush1.bf16.msra.mxu0 %v4057_v30  ;;  %v4122_v30 = vcombine.high %v769_v57, %v773_v23  ;;  %v837_v17 = vld [vmem:[#allocation11 + $0x7f8] sm:$0xff] }
 0x319   :  { %2338 = vmatpush1.bf16.msra.mxu1 %v4119_v21  ;;  %2405 = vmatprep.subr.bf16.mxu0 %v4066_v22  ;;  %v4184_v21 = vcombine.high %v832_v25, %v836_v27  ;;  %v777_v22 = vld [vmem:[#allocation11 + $0x618] sm:$0xff]  ;;  %v4186_v57 = vcombine.high %v833_v16, %v837_v17  ;;  %v4185_v25 = vcombine.low %v833_v16, %v837_v17  ;;  %v4529_v16 = vld [vmem:[#allocation12 + $0x100] ss:$8 sps:$4 sm:$0xff]  }
 0x31a   :  { %2339 = vmatprep.subr.bf16.mxu1 %v4128_v24  ;;  %v781_v24 = vld [vmem:[#allocation11 + $0x638] sm:$0xff] }
 0x31b   :  { %2397 = vmatmul.mubr.bf16.vlgmr.msra.gmra.mrb[16].mxu0 %v5243_v12  ;;  %v4143_v12 = vcombine.low %v792_v42, %v796_v43  ;;  %v4130_v34 = vcombine.high %v777_v22, %v781_v24  ;;  %v793_v42 = vld [vmem:[#allocation11 + $0x698] sm:$0xff] }
 0x31c   :  { %2406 = vmatpush1.bf16.msra.mxu0 %v4065_v37  ;;  %2437 = vmatprep.mubr.bf16.mxu0 %v5259_v0  ;;  %v745_v0 = vld [vmem:[#allocation11 + $0x518] sm:$0xff] }
 0x31d   :  { %2340 = vmatpush1.bf16.msra.mxu1 %v4127_v38  ;;  %2407 = vmatprep.subr.bf16.mxu0 %v4074_v39  ;;  %v4098_v3 = vcombine.high %v745_v0, %v749_v58  ;;  %v4097_v9 = vcombine.low %v745_v0, %v749_v58  ;;  %v785_v37 = vld [vmem:[#allocation11 + $0x658] sm:$0xff]  ;;  %v4129_v39 = vcombine.low %v777_v22, %v781_v24  ;;  %v4501_v22 = vld [vmem:[#allocation14 + $0x24] ss:$16 sps:$4 sm:$0xff]  }
 0x31e   :  { %2341 = vmatprep.subr.bf16.mxu1 %v4136_v40  ;;  %v789_v38 = vld [vmem:[#allocation11 + $0x678] sm:$0xff]  ;;  %v4469_v40 = vld [vmem:[#allocation12] ss:$8 sps:$4 sm:$0xff]   ;;  %v4153_v0 = vcombine.low %v801_v48, %v805_v49 }
 0x31f   :  { %v4138_v11 = vcombine.high %v785_v37, %v789_v38  ;;  %v797_v43 = vld [vmem:[#allocation11 + $0x6b8] sm:$0xff] }
 0x320   :  { %2408 = vmatpush1.bf16.msra.mxu0 %v4073_v44  ;;  %v4137_v44 = vcombine.low %v785_v37, %v789_v38  ;;  %v4145_v50 = vcombine.low %v793_v42, %v797_v43  ;;  %v4478_v58 = vld [vmem:[#allocation12 + $0x30] ss:$8 sps:$4 sm:$0xff]   ;;  %v4492_v23 = vld [vmem:[#allocation12 + $0x74] ss:$8 sps:$4 sm:$0xff]   ;;  %v4510_v37 = vld [vmem:[#allocation12 + $0xa4] ss:$8 sps:$4 sm:$0xff]  }
 0x321   :  { %2342 = vmatpush1.bf16.msra.mxu1 %v4135_v45  ;;  %2409 = vmatprep.subr.bf16.mxu0 %v4082_v46  ;;  %v4472_v45 = vld [vmem:[#allocation12 + $0x10] ss:$8 sps:$4 sm:$0xff]   ;;  %v4146_v46 = vcombine.high %v793_v42, %v797_v43  ;;  %v4504_v24 = vld [vmem:[#allocation12 + $0x94] ss:$8 sps:$4 sm:$0xff]   ;;  %v4579_v43 = vld [vmem:[#allocation15 + $0x4] ss:$8 sps:$4 sm:$0xff]  }
 0x322   :  { %2343 = vmatprep.subr.bf16.mxu1 %v4144_v47  ;;  %v4477_v47 = vld [vmem:[#allocation12 + $0x24] ss:$8 sps:$4 sm:$0xff]   ;;  %v4490_v27 = vld [vmem:[#allocation12 + $0x70] ss:$8 sps:$4 sm:$0xff]  }
 0x323   :  { %v4514_v42 = vld [vmem:[#allocation12 + $0xb0] ss:$8 sps:$4 sm:$0xff]  }
 0x324   :  { %2410 = vmatpush1.bf16.msra.mxu0 %v4081_v52  ;;  %v4154_v52 = vcombine.high %v801_v48, %v805_v49  ;;  %v4522_v48 = vld [vmem:[#allocation12 + $0xd4] ss:$8 sps:$4 sm:$0xff]   ;;  %v4580_v49 = vld [vmem:[#allocation15 + $0x10] ss:$8 sps:$4 sm:$0xff]  }
 0x325   :  { %2344 = vmatpush1.bf16.msra.mxu1 %v4143_v12  ;;  %2411 = vmatprep.subr.bf16.mxu0 %v4090_v53  ;;  %v4480_v12 = vld [vmem:[#allocation12 + $0x34] ss:$8 sps:$4 sm:$0xff]  }
 0x326   :  { %2345 = vmatprep.subr.bf16.mxu1 %v4152_v56  ;;  %v809_v53 = vld [vmem:[#allocation11 + $0x718] sm:$0xff] }
 0x327   :  { %v813_v56 = vld [vmem:[#allocation11 + $0x738] sm:$0xff] }
 0x328   :  { %2412 = vmatpush1.bf16.msra.mxu0 %v4089_v63  ;;  %v4162_v59 = vcombine.high %v809_v53, %v813_v56  ;;  %v817_v63 = vld [vmem:[#allocation11 + $0x758] sm:$0xff] }
 0x329   :  { %2346 = vmatpush1.bf16.msra.mxu1 %v4151_v1  ;;  %2413 = vmatprep.subr.bf16.mxu0 %v4098_v3  ;;  %v821_v1 = vld [vmem:[#allocation11 + $0x778] sm:$0xff]  ;;  %v4161_v3 = vcombine.low %v809_v53, %v813_v56  ;;  %v4525_v56 = vld [vmem:[#allocation12 + $0xe4] ss:$8 sps:$4 sm:$0xff]  }
 0x32a   :  { %2347 = vmatprep.subr.bf16.mxu1 %v4160_v4  ;;  %v4481_v4 = vld [vmem:[#allocation12 + $0x40] ss:$8 sps:$4 sm:$0xff]   ;;  %v4170_v5 = vcombine.high %v817_v63, %v821_v1 }
 0x32c   :  { %2414 = vmatpush1.bf16.msra.mxu0 %v4097_v9  ;;  %v4169_v9 = vcombine.low %v817_v63, %v821_v1  ;;  %v4583_v63 = vld [vmem:[#allocation15 + $0x20] ss:$8 sps:$4 sm:$0xff]  }
 0x32d   :  { %2348 = vmatpush1.bf16.msra.mxu1 %v4159_v10  ;;  %2415 = vmatprep.subr.bf16.mxu0 %v4106_v13  ;;  %v4484_v10 = vld [vmem:[#allocation12 + $0x50] ss:$8 sps:$4 sm:$0xff]   ;;  %v4178_v13 = vcombine.high %v825_v7, %v829_v8 }
 0x32e   :  { %2349 = vmatprep.subr.bf16.mxu1 %v4168_v14 }
 0x330   :  { %2416 = vmatpush1.bf16.msra.mxu0 %v4105_v19 }
 0x331   :  { %2350 = vmatpush1.bf16.msra.mxu1 %v4167_v20  ;;  %2417 = vmatprep.subr.bf16.mxu0 %v4114_v54  ;;  %v4177_v20 = vcombine.low %v825_v7, %v829_v8  ;;  %v4528_v7 = vld [vmem:[#allocation12 + $0xf4] ss:$8 sps:$4 sm:$0xff]  }
 0x332   :  { %2351 = vmatprep.subr.bf16.mxu1 %v4176_v55  ;;  %v4487_v55 = vld [vmem:[#allocation12 + $0x60] ss:$8 sps:$4 sm:$0xff]  }
 0x334   :  { %2418 = vmatpush1.bf16.msra.mxu0 %v4113_v28  ;;  %v4495_v28 = vld [vmem:[#allocation14 + $0x4] ss:$16 sps:$4 sm:$0xff]  }
 0x335   :  { %2352 = vmatpush1.bf16.msra.mxu1 %v4175_v29  ;;  %2419 = vmatprep.subr.bf16.mxu0 %v4122_v30  ;;  %v4498_v29 = vld [vmem:[#allocation12 + $0x84] ss:$8 sps:$4 sm:$0xff]   ;;  %v4493_v30 = vld [vmem:[#allocation14] ss:$16 sps:$4 sm:$0xff]  }
 0x336   :  { %2353 = vmatprep.subr.bf16.mxu1 %v4184_v21  ;;  %v4496_v21 = vld [vmem:[#allocation12 + $0x80] ss:$8 sps:$4 sm:$0xff]  }
 0x338   :  { %2420 = vmatpush1.bf16.msra.mxu0 %v4121_v31  ;;  %v4499_v31 = vld [vmem:[#allocation14 + $0x20] ss:$16 sps:$4 sm:$0xff]  }
 0x339   :  { %2354 = vmatpush1.bf16.msra.mxu1 %v4183_v32  ;;  %2421 = vmatprep.subr.bf16.mxu0 %v4130_v34  ;;  %v2960_v32 = vld [vmem:[%s5344_s1] sm:$0x3]  ;;  %v4502_v34 = vld [vmem:[#allocation12 + $0x90] ss:$8 sps:$4 sm:$0xff]  }
 0x33a   :  { %2876 = vmatprep.subr.bf16.mxu1 %v4471_v36  ;;  %v4507_v36 = vld [vmem:[#allocation14 + $0xc] ss:$16 sps:$4 sm:$0xff]   ;;  %v2961_v38 = vpack.c.bf16 %v2960_v32, %v2960_v32  ;;  %v4547_v32 = vld [vmem:[#allocation12 + $0x160] ss:$8 sps:$4 sm:$0xff]  }
 0x33c   :  { %2356 = vmatmul.mubr.bf16.vlgmr.msra.gmra.mrb[12].mxu1 %v5261_v2  ;;  %2422 = vmatpush1.bf16.msra.mxu0 %v4129_v39  ;;  %v4505_v39 = vld [vmem:[#allocation14 + $0x8] ss:$16 sps:$4 sm:$0xff]  }
 0x33d   :  { %2877 = vmatpush1.bf16.msra.mxu1 %v4469_v40  ;;  %2423 = vmatprep.subr.bf16.mxu0 %v4138_v11  ;;  %v4513_v40 = vld [vmem:[#allocation14 + $0x2c] ss:$16 sps:$4 sm:$0xff]  }
 0x33e   :  { %2878 = vmatprep.subr.bf16.mxu1 %v4474_v41  ;;  %v4516_v11 = vld [vmem:[#allocation12 + $0xb4] ss:$8 sps:$4 sm:$0xff]   ;;  %v4511_v41 = vld [vmem:[#allocation14 + $0x28] ss:$16 sps:$4 sm:$0xff]  }
 0x340   :  { %2424 = vmatpush1.bf16.msra.mxu0 %v4137_v44  ;;  %v4519_v44 = vld [vmem:[#allocation12 + $0xc4] ss:$8 sps:$4 sm:$0xff]  }
 0x341   :  { %2879 = vmatpush1.bf16.msra.mxu1 %v4472_v45  ;;  %2425 = vmatprep.subr.bf16.mxu0 %v4146_v46  ;;  %v4577_v45 = vld [vmem:[#allocation15] ss:$8 sps:$4 sm:$0xff]  }
 0x342   :  { %2880 = vmatprep.subr.bf16.mxu1 %v4477_v47  ;;  %v4517_v46 = vld [vmem:[#allocation12 + $0xc0] ss:$8 sps:$4 sm:$0xff]   ;;  %v4582_v47 = vld [vmem:[#allocation15 + $0x14] ss:$8 sps:$4 sm:$0xff]  }
 0x344   :  { %2426 = vmatpush1.bf16.msra.mxu0 %v4145_v50  ;;  %v4520_v50 = vld [vmem:[#allocation12 + $0xd0] ss:$8 sps:$4 sm:$0xff]  }
 0x345   :  { %2881 = vmatpush1.bf16.msra.mxu1 %v4475_v51  ;;  %2427 = vmatprep.subr.bf16.mxu0 %v4154_v52  ;;  %v4585_v51 = vld [vmem:[#allocation15 + $0x24] ss:$8 sps:$4 sm:$0xff]  }
 0x346   :  { %2882 = vmatprep.subr.bf16.mxu1 %v4480_v12 }
 0x348   :  { %2428 = vmatpush1.bf16.msra.mxu0 %v4153_v0 }
 0x349   :  { %2883 = vmatpush1.bf16.msra.mxu1 %v4478_v58  ;;  %2429 = vmatprep.subr.bf16.mxu0 %v4162_v59 }
 0x34a   :  { %2884 = vmatprep.subr.bf16.mxu1 %v4483_v61 }
 0x34c   :  { %2430 = vmatpush1.bf16.msra.mxu0 %v4161_v3  ;;  %v4523_v3 = vld [vmem:[#allocation12 + $0xe0] ss:$8 sps:$4 sm:$0xff]  }
 0x34d   :  { %2885 = vmatpush1.bf16.msra.mxu1 %v4481_v4  ;;  %2431 = vmatprep.subr.bf16.mxu0 %v4170_v5  ;;  %v4588_v4 = vld [vmem:[#allocation15 + $0x34] ss:$8 sps:$4 sm:$0xff]  }
 0x34e   :  { %v5278_v14 = vpop.f32.mrb[4].mxu1  ;;  %2886 = vmatprep.subr.bf16.mxu1 %v4486_v6 }
 0x34f   :  { %v5280_v18 = vpop.f32.mrb[5].mxu1 }
 0x350   :  { %2432 = vmatpush1.bf16.msra.mxu0 %v4169_v9  ;;  %v2156_v19 = vpop.f32.mrb[6].mxu1  ;;  %v4586_v9 = vld [vmem:[#allocation15 + $0x30] ss:$8 sps:$4 sm:$0xff]  }
 0x351   :  { %2887 = vmatpush1.bf16.msra.mxu1 %v4484_v10  ;;  %v2157_v54 = vpop.f32.mrb[7].mxu1  ;;  %2433 = vmatprep.subr.bf16.mxu0 %v4178_v13  ;;  %v4526_v10 = vld [vmem:[#allocation12 + $0xf0] ss:$8 sps:$4 sm:$0xff]  }
 0x352   :  { %2888 = vmatprep.subr.bf16.mxu1 %v4489_v15  ;;  %v4531_v15 = vld [vmem:[#allocation12 + $0x104] ss:$8 sps:$4 sm:$0xff]   ;;  %v4532_v19 = vld [vmem:[#allocation12 + $0x110] ss:$8 sps:$4 sm:$0xff]   ;;  %v4535_v54 = vld [vmem:[#allocation12 + $0x120] ss:$8 sps:$4 sm:$0xff]  }
 0x354   :  { %2434 = vmatpush1.bf16.msra.mxu0 %v4177_v20  ;;  %v4537_v20 = vld [vmem:[#allocation12 + $0x124] ss:$8 sps:$4 sm:$0xff]  }
 0x355   :  { %2889 = vmatpush1.bf16.msra.mxu1 %v4487_v55  ;;  %2435 = vmatprep.subr.bf16.mxu0 %v4186_v57  ;;  %v4540_v55 = vld [vmem:[#allocation12 + $0x134] ss:$8 sps:$4 sm:$0xff]   ;;  %v4538_v57 = vld [vmem:[#allocation12 + $0x130] ss:$8 sps:$4 sm:$0xff]  }
 0x356   :  { %2890 = vmatprep.subr.bf16.mxu1 %v4492_v23  ;;  %v4543_v23 = vld [vmem:[#allocation12 + $0x144] ss:$8 sps:$4 sm:$0xff]  }
 0x358   :  { %2436 = vmatpush1.bf16.msra.mxu0 %v4185_v25  ;;  %v4541_v25 = vld [vmem:[#allocation12 + $0x140] ss:$8 sps:$4 sm:$0xff]  }
 0x359   :  { %2891 = vmatpush1.bf16.msra.mxu1 %v4490_v27  ;;  %3035 = vmatprep.subr.bf16.mxu0 %v4495_v28  ;;  %v4546_v27 = vld [vmem:[#allocation12 + $0x154] ss:$8 sps:$4 sm:$0xff]   ;;  %v4544_v28 = vld [vmem:[#allocation12 + $0x150] ss:$8 sps:$4 sm:$0xff]  }
 0x35a   :  { %2892 = vmatprep.subr.bf16.mxu1 %v4498_v29 }
 0x35b   :  { %2438 = vmatmul.mubr.bf16.vlgmr.msra.gmra.mrb[16].mxu0 %v5261_v2  ;;  %v4508_v2 = vld [vmem:[#allocation12 + $0xa0] ss:$8 sps:$4 sm:$0xff]  }
 0x35c   :  { %3036 = vmatpush1.bf16.msra.mxu0 %v4493_v30  ;;  %3067 = vmatprep.mubr.bf16.mxu0 %v4986_v26  ;;  %v4549_v30 = vld [vmem:[#allocation12 + $0x164] ss:$8 sps:$4 sm:$0xff]  }
 0x35d   :  { %2893 = vmatpush1.bf16.msra.mxu1 %v4496_v21  ;;  %3037 = vmatprep.subr.bf16.mxu0 %v4501_v22 }
 0x35e   :  { %2894 = vmatprep.subr.bf16.mxu1 %v4504_v24  ;;  %v4591_v24 = vld [vmem:[#allocation15 + $0x44] ss:$8 sps:$4 sm:$0xff]  }
 0x360   :  { %3038 = vmatpush1.bf16.msra.mxu0 %v4499_v31 }
 0x361   :  { %2895 = vmatpush1.bf16.msra.mxu1 %v4502_v34  ;;  %3076 = vmatprep.subr.bf16.mxu0 %v4507_v36  ;;  %v4589_v34 = vld [vmem:[#allocation15 + $0x40] ss:$8 sps:$4 sm:$0xff]   ;;  %v4552_v36 = vld [vmem:[#allocation12 + $0x174] ss:$8 sps:$4 sm:$0xff]  }
 0x362   :  { %2896 = vmatprep.subr.bf16.mxu1 %v4510_v37  ;;  %v4594_v37 = vld [vmem:[#allocation15 + $0x54] ss:$8 sps:$4 sm:$0xff]  }
 0x363   :  { %4259 = vmatmul.mubr.msk.bf16.vlgmr.msra.gmra.mrb[20].mxu0 %vm198_vm1, %v2961_v38 }
 0x364   :  { %3077 = vmatpush1.bf16.msra.mxu0 %v4505_v39  ;;  %3108 = vmatprep.mubr.bf16.mxu0 %v4986_v26  ;;  %v5293_v26 = vld [vmem:[%s5350_s7] sm:$0xf]  ;;  %s3896_s7 = sld [smem:[#allocation18 + $0x1]] }
 0x365   :  { %2897 = vmatpush1.bf16.msra.mxu1 %v4508_v2  ;;  %3078 = vmatprep.subr.bf16.mxu0 %v4513_v40  ;;  %v2451_v12 = vrot.slane %v5293_v26, %v5228_v60  ;;  %v2455_v53 = vrot.slane %v5293_v26, %v5235_v62  ;;  %v4597_v39 = vld [vmem:[#allocation15 + $0x64] ss:$8 sps:$4 sm:$0xff]   ;;  %v4550_v2 = vld [vmem:[#allocation12 + $0x170] ss:$8 sps:$4 sm:$0xff]  }
 0x366   :  { %2898 = vmatprep.subr.bf16.mxu1 %v4516_v11  ;;  %v4555_v40 = vld [vmem:[#allocation12 + $0x184] ss:$8 sps:$4 sm:$0xff]   ;;  %v4595_v11 = vld [vmem:[#allocation15 + $0x60] ss:$8 sps:$4 sm:$0xff]  }
 0x368   :  { %3079 = vmatpush1.bf16.msra.mxu0 %v4511_v41  ;;  %v4600_v41 = vld [vmem:[#allocation15 + $0x74] ss:$8 sps:$4 sm:$0xff]  }
 0x369   :  { %2899 = vmatpush1.bf16.msra.mxu1 %v4514_v42  ;;  %3535 = vmatprep.subr.bf16.mxu0 %v4579_v43  ;;  %v4553_v42 = vld [vmem:[#allocation12 + $0x180] ss:$8 sps:$4 sm:$0xff]   ;;  %v4558_v43 = vld [vmem:[#allocation12 + $0x194] ss:$8 sps:$4 sm:$0xff]  }
 0x36a   :  { %2900 = vmatprep.subr.bf16.mxu1 %v4519_v44  ;;  %v4598_v44 = vld [vmem:[#allocation15 + $0x70] ss:$8 sps:$4 sm:$0xff]  }
 0x36b   :  { %4260 = vmatmul.mubr.msk.bf16.vlgmr.msra.gmra.mrb[24].mxu0 %vm198_vm1, %v2961_v38  ;;  %v4592_v38 = vld [vmem:[#allocation15 + $0x50] ss:$8 sps:$4 sm:$0xff]  }
 0x36c   :  { %3536 = vmatpush1.bf16.msra.mxu0 %v4577_v45  ;;  %v4603_v45 = vld [vmem:[#allocation15 + $0x84] ss:$8 sps:$4 sm:$0xff]  }
 0x36d   :  { %2901 = vmatpush1.bf16.msra.mxu1 %v4517_v46  ;;  %3537 = vmatprep.subr.bf16.mxu0 %v4582_v47  ;;  %v4556_v46 = vld [vmem:[#allocation12 + $0x190] ss:$8 sps:$4 sm:$0xff]   ;;  %v4561_v47 = vld [vmem:[#allocation12 + $0x1a4] ss:$8 sps:$4 sm:$0xff]  }
 0x36e   :  { %v2193_v52 = vpop.f32.mrb[8].mxu0  ;;  %2902 = vmatprep.subr.bf16.mxu1 %v4522_v48  ;;  %v4601_v48 = vld [vmem:[#allocation15 + $0x80] ss:$8 sps:$4 sm:$0xff]  }
 0x36f   :  { %v2194_v0 = vadd.f32 %v2193_v52, %v5278_v14  ;;  %v2195_v58 = vpop.f32.mrb[9].mxu0  ;;  %v4604_v52 = vld [vmem:[#allocation15 + $0x90] ss:$8 sps:$4 sm:$0xff]  }
 0x370   :  { %v2196_v59 = vadd.f32 %v2195_v58, %v5280_v18  ;;  %v2197_v61 = vpop.f32.mrb[10].mxu0  ;;  %3538 = vmatpush1.bf16.msra.mxu0 %v4580_v49  ;;  %v4534_v18 = vld [vmem:[#allocation12 + $0x114] ss:$8 sps:$4 sm:$0xff]   ;;  %v4565_v58 = vld [vmem:[#allocation12 + $0x1c0] ss:$8 sps:$4 sm:$0xff]  }
 0x371   :  { %2903 = vmatpush1.bf16.msra.mxu1 %v4520_v50  ;;  %v2198_v1 = vpop.f32.mrb[11].mxu0  ;;  %3539 = vmatprep.subr.bf16.mxu0 %v4585_v51  ;;  %v2468_v5 = vadd.f32 %v2451_v12, %v2194_v0  ;;  %v4606_v49 = vld [vmem:[#allocation15 + $0x94] ss:$8 sps:$4 sm:$0xff]   ;;  %v4559_v50 = vld [vmem:[#allocation12 + $0x1a0] ss:$8 sps:$4 sm:$0xff]  }
 0x372   :  { %v2469_v6 = vadd.f32 %v2455_v53, %v2196_v59  ;;  %2904 = vmatprep.subr.bf16.mxu1 %v4525_v56  ;;  %v4564_v51 = vld [vmem:[#allocation12 + $0x1b4] ss:$8 sps:$4 sm:$0xff]   ;;  %v4609_v12 = vld [vmem:[#allocation15 + $0xa4] ss:$8 sps:$4 sm:$0xff]   ;;  %v4562_v53 = vld [vmem:[#allocation12 + $0x1b0] ss:$8 sps:$4 sm:$0xff]  }
 0x373   :  { %v2472_v13 = vmax.f32 %v2468_v5, 0.0  ;;  %v4567_v56 = vld [vmem:[#allocation12 + $0x1c4] ss:$8 sps:$4 sm:$0xff]   ;;  %v4607_v0 = vld [vmem:[#allocation15 + $0xa0] ss:$8 sps:$4 sm:$0xff]   ;;  %v2463_v5 = vrot.slane %v5293_v26, %v5253_v35 }
 0x374   :  { %v2473_v8 = vmax.f32 %v2469_v6, 0.0  ;;  %3540 = vmatpush1.bf16.msra.mxu0 %v4583_v63  ;;  %v4570_v59 = vld [vmem:[#allocation12 + $0x1d4] ss:$8 sps:$4 sm:$0xff]   ;;  %v2459_v63 = vrot.slane %v5293_v26, %v5251_v33  ;;  %v4568_v1 = vld [vmem:[#allocation12 + $0x1d0] ss:$8 sps:$4 sm:$0xff]  }
 0x375   :  { %2905 = vmatpush1.bf16.msra.mxu1 %v4523_v3  ;;  %3541 = vmatprep.subr.bf16.mxu0 %v4588_v4  ;;  %v2476_v17 = vpack.c.bf16 %v2472_v13, %v2472_v13  ;;  %v4612_v61 = vld [vmem:[#allocation15 + $0xb4] ss:$8 sps:$4 sm:$0xff]   ;;  %v4610_v3 = vld [vmem:[#allocation15 + $0xb0] ss:$8 sps:$4 sm:$0xff]   ;;  %v4573_v6 = vld [vmem:[#allocation12 + $0x1e4] ss:$8 sps:$4 sm:$0xff]  }
 0x376   :  { %v2477_v14 = vpack.c.bf16 %v2473_v8, %v2473_v8  ;;  %2906 = vmatprep.subr.bf16.mxu1 %v4528_v7  ;;  %v4615_v13 = vld [vmem:[#allocation15 + $0xc4] ss:$8 sps:$4 sm:$0xff]  }
 0x378   :  { %2908 = vmatprep.mubr.bf16.mxu1 %v2477_v14  ;;  %3542 = vmatpush1.bf16.msra.mxu0 %v4586_v9 }
 0x379   :  { %2907 = vmatpush1.bf16.msra.mxu1 %v4526_v10  ;;  %3543 = vmatprep.subr.bf16.mxu0 %v4591_v24  ;;  %v4643_v24 = vld [vmem:[#allocation17] ss:$8 sps:$4 sm:$0xff]  }
 0x37a   :  { %2917 = vmatprep.subr.bf16.mxu1 %v4531_v15 }
 0x37c   :  { %2909 = vmatmul.mubr.bf16.vlgmr.msra.gmra.mrb[16].mxu1 %v2476_v17  ;;  %3544 = vmatpush1.bf16.msra.mxu0 %v4589_v34  ;;  %v4613_v17 = vld [vmem:[#allocation15 + $0xc0] ss:$8 sps:$4 sm:$0xff]   ;;  %v4657_v34 = vld [vmem:[#allocation17 + $0x24] ss:$8 sps:$4 sm:$0xff]  }
 0x37d   :  { %2918 = vmatpush1.bf16.msra.mxu1 %v4529_v16  ;;  %3545 = vmatprep.subr.bf16.mxu0 %v4594_v37  ;;  %v4571_v16 = vld [vmem:[#allocation12 + $0x1e0] ss:$8 sps:$4 sm:$0xff]   ;;  %v4663_v37 = vld [vmem:[#allocation17 + $0x34] ss:$8 sps:$4 sm:$0xff]  }
 0x37e   :  { %2919 = vmatprep.subr.bf16.mxu1 %v4534_v18 }
 0x380   :  { %3546 = vmatpush1.bf16.msra.mxu0 %v4592_v38  ;;  %v4661_v38 = vld [vmem:[#allocation17 + $0x30] ss:$8 sps:$4 sm:$0xff]  }
 0x381   :  { %2920 = vmatpush1.bf16.msra.mxu1 %v4532_v19  ;;  %3547 = vmatprep.subr.bf16.mxu0 %v4597_v39  ;;  %v4576_v19 = vld [vmem:[#allocation12 + $0x1f4] ss:$8 sps:$4 sm:$0xff]   ;;  %v4669_v39 = vld [vmem:[#allocation17 + $0x44] ss:$8 sps:$4 sm:$0xff]  }
 0x382   :  { %2921 = vmatprep.subr.bf16.mxu1 %v4537_v20  ;;  %v4618_v20 = vld [vmem:[#allocation15 + $0xd4] ss:$8 sps:$4 sm:$0xff]  }
 0x384   :  { %3548 = vmatpush1.bf16.msra.mxu0 %v4595_v11  ;;  %v4673_v11 = vld [vmem:[#allocation17 + $0x50] ss:$8 sps:$4 sm:$0xff]  }
 0x385   :  { %2922 = vmatpush1.bf16.msra.mxu1 %v4535_v54  ;;  %3549 = vmatprep.subr.bf16.mxu0 %v4600_v41  ;;  %v4574_v54 = vld [vmem:[#allocation12 + $0x1f0] ss:$8 sps:$4 sm:$0xff]   ;;  %v4681_v41 = vld [vmem:[#allocation17 + $0x64] ss:$8 sps:$4 sm:$0xff]  }
 0x386   :  { %2923 = vmatprep.subr.bf16.mxu1 %v4540_v55  ;;  %v4616_v55 = vld [vmem:[#allocation15 + $0xd0] ss:$8 sps:$4 sm:$0xff]  }
 0x388   :  { %3550 = vmatpush1.bf16.msra.mxu0 %v4598_v44  ;;  %v4685_v44 = vld [vmem:[#allocation17 + $0x70] ss:$8 sps:$4 sm:$0xff]  }
 0x389   :  { %2924 = vmatpush1.bf16.msra.mxu1 %v4538_v57  ;;  %3551 = vmatprep.subr.bf16.mxu0 %v4603_v45  ;;  %v4693_v45 = vld [vmem:[#allocation17 + $0x84] ss:$8 sps:$4 sm:$0xff]  }
 0x38a   :  { %2925 = vmatprep.subr.bf16.mxu1 %v4543_v23 }
 0x38c   :  { %3552 = vmatpush1.bf16.msra.mxu0 %v4601_v48  ;;  %v4697_v48 = vld [vmem:[#allocation17 + $0x90] ss:$8 sps:$4 sm:$0xff]  }
 0x38d   :  { %2926 = vmatpush1.bf16.msra.mxu1 %v4541_v25  ;;  %3553 = vmatprep.subr.bf16.mxu0 %v4606_v49  ;;  %v4621_v25 = vld [vmem:[#allocation15 + $0xe4] ss:$8 sps:$4 sm:$0xff]  }
 0x38e   :  { %v5301_v29 = vpop.f32.mrb[8].mxu1  ;;  %2927 = vmatprep.subr.bf16.mxu1 %v4546_v27  ;;  %v4619_v27 = vld [vmem:[#allocation15 + $0xe0] ss:$8 sps:$4 sm:$0xff]   ;;  %v4705_v49 = vld [vmem:[#allocation17 + $0xa4] ss:$8 sps:$4 sm:$0xff]  }
 0x38f   :  { %v5303_v21 = vpop.f32.mrb[9].mxu1 }
 0x390   :  { %v2238_v22 = vpop.f32.mrb[10].mxu1  ;;  %3554 = vmatpush1.bf16.msra.mxu0 %v4604_v52  ;;  %v4708_v52 = vld [vmem:[#allocation17 + $0xb4] ss:$8 sps:$4 sm:$0xff]  }
 0x391   :  { %2928 = vmatpush1.bf16.msra.mxu1 %v4544_v28  ;;  %v2239_v31 = vpop.f32.mrb[11].mxu1  ;;  %3555 = vmatprep.subr.bf16.mxu0 %v4609_v12  ;;  %v4645_v22 = vld [vmem:[#allocation17 + $0x4] ss:$8 sps:$4 sm:$0xff]  }
 0x392   :  { %2929 = vmatprep.subr.bf16.mxu1 %v4549_v30  ;;  %v4622_v30 = vld [vmem:[#allocation15 + $0xf0] ss:$8 sps:$4 sm:$0xff]   ;;  %v4651_v31 = vld [vmem:[#allocation17 + $0x14] ss:$8 sps:$4 sm:$0xff]   ;;  %v4711_v12 = vld [vmem:[#allocation17 + $0xc4] ss:$8 sps:$4 sm:$0xff]  }
 0x394   :  { %3556 = vmatpush1.bf16.msra.mxu0 %v4607_v0  ;;  %v4712_v0 = vld [vmem:[#allocation17 + $0xd0] ss:$8 sps:$4 sm:$0xff]  }
 0x395   :  { %2930 = vmatpush1.bf16.msra.mxu1 %v4547_v32  ;;  %3557 = vmatprep.subr.bf16.mxu0 %v4612_v61  ;;  %v4649_v32 = vld [vmem:[#allocation17 + $0x10] ss:$8 sps:$4 sm:$0xff]  }
 0x396   :  { %2931 = vmatprep.subr.bf16.mxu1 %v4552_v36  ;;  %v4655_v36 = vld [vmem:[#allocation17 + $0x20] ss:$8 sps:$4 sm:$0xff]  }
 0x398   :  { %3558 = vmatpush1.bf16.msra.mxu0 %v4610_v3 }
 0x399   :  { %2932 = vmatpush1.bf16.msra.mxu1 %v4550_v2  ;;  %3559 = vmatprep.subr.bf16.mxu0 %v4615_v13  ;;  %v4667_v2 = vld [vmem:[#allocation17 + $0x40] ss:$8 sps:$4 sm:$0xff]   ;;  %v2970_v13 = vld [vmem:[%s5354_s11] sm:$0xf] }
 0x39a   :  { %2933 = vmatprep.subr.bf16.mxu1 %v4555_v40  ;;  %v4675_v40 = vld [vmem:[#allocation17 + $0x54] ss:$8 sps:$4 sm:$0xff]  }
 0x39c   :  { %3560 = vmatpush1.bf16.msra.mxu0 %v4613_v17 }
 0x39d   :  { %2934 = vmatpush1.bf16.msra.mxu1 %v4553_v42  ;;  %3561 = vmatprep.subr.bf16.mxu0 %v4618_v20  ;;  %v4679_v42 = vld [vmem:[#allocation17 + $0x60] ss:$8 sps:$4 sm:$0xff]  }
 0x39e   :  { %2935 = vmatprep.subr.bf16.mxu1 %v4558_v43  ;;  %v4687_v43 = vld [vmem:[#allocation17 + $0x74] ss:$8 sps:$4 sm:$0xff]  }
 0x3a0   :  { %3562 = vmatpush1.bf16.msra.mxu0 %v4616_v55 }
 0x3a1   :  { %2936 = vmatpush1.bf16.msra.mxu1 %v4556_v46  ;;  %3563 = vmatprep.subr.bf16.mxu0 %v4621_v25  ;;  %v4691_v46 = vld [vmem:[#allocation17 + $0x80] ss:$8 sps:$4 sm:$0xff]  }
 0x3a2   :  { %2937 = vmatprep.subr.bf16.mxu1 %v4561_v47  ;;  %v4699_v47 = vld [vmem:[#allocation17 + $0x94] ss:$8 sps:$4 sm:$0xff]  }
 0x3a4   :  { %3564 = vmatpush1.bf16.msra.mxu0 %v4619_v27 }
 0x3a5   :  { %2938 = vmatpush1.bf16.msra.mxu1 %v4559_v50  ;;  %v4703_v50 = vld [vmem:[#allocation17 + $0xa0] ss:$8 sps:$4 sm:$0xff]  }
 0x3a6   :  { %2939 = vmatprep.subr.bf16.mxu1 %v4564_v51  ;;  %v4706_v51 = vld [vmem:[#allocation17 + $0xb0] ss:$8 sps:$4 sm:$0xff]  }
 0x3a9   :  { %2940 = vmatpush1.bf16.msra.mxu1 %v4562_v53  ;;  %v4709_v53 = vld [vmem:[#allocation17 + $0xc0] ss:$8 sps:$4 sm:$0xff]  }
 0x3aa   :  { %2941 = vmatprep.subr.bf16.mxu1 %v4567_v56  ;;  %v4714_v56 = vld [vmem:[#allocation17 + $0xd4] ss:$8 sps:$4 sm:$0xff]  }
 0x3ad   :  { %2942 = vmatpush1.bf16.msra.mxu1 %v4565_v58 }
 0x3ae   :  { %v2275_v4 = vpop.f32.mrb[12].mxu0  ;;  %2943 = vmatprep.subr.bf16.mxu1 %v4570_v59  ;;  %v4717_v59 = vld [vmem:[#allocation17 + $0xe4] ss:$8 sps:$4 sm:$0xff]  }
 0x3af   :  { %v2276_v7 = vadd.f32 %v2275_v4, %v5301_v29  ;;  %v2277_v8 = vpop.f32.mrb[13].mxu0  ;;  %v4624_v29 = vld [vmem:[#allocation15 + $0xf4] ss:$8 sps:$4 sm:$0xff]  }
 0x3b0   :  { %v2278_v9 = vadd.f32 %v2277_v8, %v5303_v21  ;;  %v2279_v10 = vpop.f32.mrb[14].mxu0  ;;  %3565 = vmatprep.subr.bf16.mxu0 %v4624_v29  ;;  %v4627_v21 = vld [vmem:[#allocation15 + $0x104] ss:$8 sps:$4 sm:$0xff]   ;;  %v4720_v4 = vld [vmem:[#allocation17 + $0xf4] ss:$8 sps:$4 sm:$0xff]   ;;  %v2983_v29 = vrot.slane %v2970_v13, %v5251_v33 }
 0x3b1   :  { %v2470_v14 = vadd.f32 %v2459_v63, %v2276_v7  ;;  %v2280_v15 = vpop.f32.mrb[15].mxu0  ;;  %2944 = vmatpush1.bf16.msra.mxu1 %v4568_v1  ;;  %3566 = vmatpush1.bf16.msra.mxu0 %v4622_v30  ;;  %v4715_v63 = vld [vmem:[#allocation17 + $0xe0] ss:$8 sps:$4 sm:$0xff]  }
 0x3b2   :  { %v2471_v18 = vadd.f32 %v2463_v5, %v2278_v9  ;;  %2945 = vmatprep.subr.bf16.mxu1 %v4573_v6  ;;  %3576 = vmatprep.subr.bf16.mxu0 %v4627_v21  ;;  %v4718_v5 = vld [vmem:[#allocation17 + $0xf0] ss:$8 sps:$4 sm:$0xff]   ;;  %v3117_v6 = vstv %s3896_s7  ;;  %v2975_v15 = vrot.slane %v2970_v13, %v5228_v60  ;;  %v2987_v21 = vrot.slane %v2970_v13, %v5253_v35 }
 0x3b3   :  { %v2474_v57 = vmax.f32 %v2470_v14, 0.0 }
 0x3b4   :  { %v2475_v26 = vmax.f32 %v2471_v18, 0.0  ;;  %v3122_v18 = vstv %s273_s2 }
 0x3b5   :  { %2946 = vmatpush1.bf16.msra.mxu1 %v4571_v16  ;;  %v2478_v28 = vpack.c.bf16 %v2474_v57, %v2474_v57  ;;  %v2979_v16 = vrot.slane %v2970_v13, %v5235_v62  ;;  %v4688_v13 = vld [vmem:[#allocation15 + $0x1d0] ss:$8 sps:$4 sm:$0xff]  }
 0x3b6   :  { %v2479_v23 = vpack.c.bf16 %v2475_v26, %v2475_v26  ;;  %2947 = vmatprep.subr.bf16.mxu1 %v4576_v19 }
 0x3b8   :  { %2949 = vmatprep.mubr.bf16.mxu1 %v2479_v23 }
 0x3b9   :  { %2948 = vmatpush1.bf16.msra.mxu1 %v4574_v54 }
 0x3ba   :  { %3811 = vmatprep.subr.bf16.mxu1 %v4645_v22 }
 0x3bc   :  { %2950 = vmatmul.mubr.bf16.vlgmr.msra.gmra.mrb[16].mxu1 %v2478_v28 }
 0x3bd   :  { %3812 = vmatpush1.bf16.msra.mxu1 %v4643_v24 }
 0x3be   :  { %3813 = vmatprep.subr.bf16.mxu1 %v4651_v31 }
 0x3c1   :  { %3814 = vmatpush1.bf16.msra.mxu1 %v4649_v32 }
 0x3c2   :  { %3815 = vmatprep.subr.bf16.mxu1 %v4657_v34 }
 0x3c5   :  { %3816 = vmatpush1.bf16.msra.mxu1 %v4655_v36 }
 0x3c6   :  { %3817 = vmatprep.subr.bf16.mxu1 %v4663_v37 }
 0x3c9   :  { %3818 = vmatpush1.bf16.msra.mxu1 %v4661_v38  ;;  %v4625_v38 = vld [vmem:[#allocation15 + $0x100] ss:$8 sps:$4 sm:$0xff]  }
 0x3ca   :  { %3819 = vmatprep.subr.bf16.mxu1 %v4669_v39 }
 0x3cd   :  { %3820 = vmatpush1.bf16.msra.mxu1 %v4667_v2 }
 0x3ce   :  { %3821 = vmatprep.subr.bf16.mxu1 %v4675_v40 }
 0x3d1   :  { %3822 = vmatpush1.bf16.msra.mxu1 %v4673_v11  ;;  %v4630_v11 = vld [vmem:[#allocation15 + $0x114] ss:$8 sps:$4 sm:$0xff]  }
 0x3d2   :  { %3823 = vmatprep.subr.bf16.mxu1 %v4681_v41 }
 0x3d5   :  { %3824 = vmatpush1.bf16.msra.mxu1 %v4679_v42 }
 0x3d6   :  { %3825 = vmatprep.subr.bf16.mxu1 %v4687_v43 }
 0x3d9   :  { %3826 = vmatpush1.bf16.msra.mxu1 %v4685_v44  ;;  %v4628_v44 = vld [vmem:[#allocation15 + $0x110] ss:$8 sps:$4 sm:$0xff]  }
 0x3da   :  { %3827 = vmatprep.subr.bf16.mxu1 %v4693_v45  ;;  %v4633_v45 = vld [vmem:[#allocation15 + $0x124] ss:$8 sps:$4 sm:$0xff]  }
 0x3dd   :  { %3828 = vmatpush1.bf16.msra.mxu1 %v4691_v46 }
 0x3de   :  { %3829 = vmatprep.subr.bf16.mxu1 %v4699_v47  ;;  %v4631_v47 = vld [vmem:[#allocation15 + $0x120] ss:$8 sps:$4 sm:$0xff]  }
 0x3e1   :  { %3830 = vmatpush1.bf16.msra.mxu1 %v4697_v48 }
 0x3e2   :  { %3831 = vmatprep.subr.bf16.mxu1 %v4705_v49  ;;  %v4636_v49 = vld [vmem:[#allocation15 + $0x134] ss:$8 sps:$4 sm:$0xff]  }
 0x3e5   :  { %3832 = vmatpush1.bf16.msra.mxu1 %v4703_v50  ;;  %v4634_v50 = vld [vmem:[#allocation15 + $0x130] ss:$8 sps:$4 sm:$0xff]  }
 0x3e6   :  { %3833 = vmatprep.subr.bf16.mxu1 %v4708_v52  ;;  %v4637_v52 = vld [vmem:[#allocation15 + $0x140] ss:$8 sps:$4 sm:$0xff]  }
 0x3e9   :  { %3834 = vmatpush1.bf16.msra.mxu1 %v4706_v51  ;;  %v4639_v51 = vld [vmem:[#allocation15 + $0x144] ss:$8 sps:$4 sm:$0xff]  }
 0x3ea   :  { %3835 = vmatprep.subr.bf16.mxu1 %v4711_v12  ;;  %v4642_v12 = vld [vmem:[#allocation15 + $0x154] ss:$8 sps:$4 sm:$0xff]  }
 0x3ed   :  { %3836 = vmatpush1.bf16.msra.mxu1 %v4709_v53  ;;  %v4640_v53 = vld [vmem:[#allocation15 + $0x150] ss:$8 sps:$4 sm:$0xff]  }
 0x3ee   :  { %3837 = vmatprep.subr.bf16.mxu1 %v4714_v56  ;;  %v4648_v56 = vld [vmem:[#allocation15 + $0x164] ss:$8 sps:$4 sm:$0xff]  }
 0x3f1   :  { %3838 = vmatpush1.bf16.msra.mxu1 %v4712_v0  ;;  %v4646_v0 = vld [vmem:[#allocation15 + $0x160] ss:$8 sps:$4 sm:$0xff]  }
 0x3f2   :  { %3839 = vmatprep.subr.bf16.mxu1 %v4717_v59  ;;  %v4652_v59 = vld [vmem:[#allocation15 + $0x170] ss:$8 sps:$4 sm:$0xff]  }
 0x3f5   :  { %3840 = vmatpush1.bf16.msra.mxu1 %v4715_v63  ;;  %v4658_v63 = vld [vmem:[#allocation15 + $0x180] ss:$8 sps:$4 sm:$0xff]  }
 0x3f6   :  { %3841 = vmatprep.subr.bf16.mxu1 %v4720_v4  ;;  %v4672_v4 = vld [vmem:[#allocation15 + $0x1a4] ss:$8 sps:$4 sm:$0xff]  }
 0x3f9   :  { %3842 = vmatpush1.bf16.msra.mxu1 %v4718_v5  ;;  %v4670_v5 = vld [vmem:[#allocation15 + $0x1a0] ss:$8 sps:$4 sm:$0xff]  }
 0x40f   :  { %v2357_v58 = vpop.f32.mrb[12].mxu1 }
 0x410   :  { %v2359_v61 = vpop.f32.mrb[13].mxu1  ;;  %v3118_v55 = vmul.f32 %v3117_v6, %v2357_v58  ;;  %v4654_v58 = vld [vmem:[#allocation15 + $0x174] ss:$8 sps:$4 sm:$0xff]  }
 0x411   :  { %v2361_v1 = vpop.f32.mrb[14].mxu1  ;;  %v3119_v25 = vmul.f32 %v3117_v6, %v2359_v61  ;;  %v4660_v61 = vld [vmem:[#allocation15 + $0x184] ss:$8 sps:$4 sm:$0xff]  }
 0x412   :  { %v2362_v3 = vpop.f32.mrb[15].mxu1  ;;  %v4666_v1 = vld [vmem:[#allocation15 + $0x194] ss:$8 sps:$4 sm:$0xff]  }
 0x413   :  { %v4664_v3 = vld [vmem:[#allocation15 + $0x190] ss:$8 sps:$4 sm:$0xff]  }
 0x42e   :  { %v2439_v7 = vpop.f32.mrb[16].mxu0 }
 0x42f   :  { %v3120_v8 = vmul.f32 %v3117_v6, %v2439_v7  ;;  %v2441_v9 = vpop.f32.mrb[17].mxu0  ;;  %v4676_v7 = vld [vmem:[#allocation15 + $0x1b0] ss:$8 sps:$4 sm:$0xff]  }
 0x430   :  { %v2443_v10 = vpop.f32.mrb[18].mxu0  ;;  %v3121_v42 = vmul.f32 %v3117_v6, %v2441_v9  ;;  %v4678_v6 = vld [vmem:[#allocation15 + $0x1b4] ss:$8 sps:$4 sm:$0xff]   ;;  %v4682_v9 = vld [vmem:[#allocation15 + $0x1c0] ss:$8 sps:$4 sm:$0xff]  }
 0x431   :  { %v2444_v14 = vpop.f32.mrb[19].mxu0  ;;  %v4690_v10 = vld [vmem:[#allocation15 + $0x1d4] ss:$8 sps:$4 sm:$0xff]  }
 0x432   :  { %v4696_v14 = vld [vmem:[#allocation15 + $0x1e4] ss:$8 sps:$4 sm:$0xff]  }
 0x436   :  { %v3069_v17 = vpop.f32.mrb[20].mxu0 }
 0x437   :  { %v3070_v19 = vadd.f32 %v3069_v17, %v2975_v15  ;;  %v3071_v26 = vpop.f32.mrb[21].mxu0  ;;  %v4694_v15 = vld [vmem:[#allocation15 + $0x1e0] ss:$8 sps:$4 sm:$0xff]   ;;  %v4700_v17 = vld [vmem:[#allocation15 + $0x1f0] ss:$8 sps:$4 sm:$0xff]  }
 0x438   :  { %v3072_v20 = vadd.f32 %v3071_v26, %v2979_v16  ;;  %v3073_v54 = vpop.f32.mrb[22].mxu0  ;;  %v4702_v16 = vld [vmem:[#allocation15 + $0x1f4] ss:$8 sps:$4 sm:$0xff]   ;;  %v2544_v26 = vld [vmem:[%s5352_s9] sm:$0x3]  ;;  %s3897_s9 = sld [smem:[#allocation18 + $0x2]] }
 0x439   :  { %v3123_v57 = vmul.f32 %v3122_v18, %v3070_v19  ;;  %v3074_v23 = vpop.f32.mrb[23].mxu0  ;;  %v2553_v54 = vrot.slane %v2544_v26, %v5235_v62 }
 0x43a   :  { %v3124_v27 = vmul.f32 %v3122_v18, %v3072_v20  ;;  %v2549_v20 = vrot.slane %v2544_v26, %v5228_v60 }
 0x43b   :  { %v3127_v28 = vadd.f32 %v3123_v57, %v3118_v55 }
 0x43c   :  { %v3128_v30 = vadd.f32 %v3124_v27, %v3119_v25 }
 0x43d   :  { %v3131_v22 = vmax.f32 %v3127_v28, 0.0 }
 0x43e   :  { %v3110_v24 = vpop.f32.mrb[24].mxu0  ;;  %v3132_v31 = vmax.f32 %v3128_v30, 0.0 }
 0x43f   :  { %v3111_v32 = vadd.f32 %v3110_v24, %v2983_v29  ;;  %v3112_v34 = vpop.f32.mrb[25].mxu0  ;;  %v3135_v2 = vpack.c.bf16 %v3131_v22, %v3131_v22 }
 0x440   :  { %v3113_v36 = vadd.f32 %v3112_v34, %v2987_v21  ;;  %v3136_v37 = vpack.c.bf16 %v3132_v31, %v3132_v31  ;;  %v3114_v39 = vpop.f32.mrb[26].mxu0 }
 0x441   :  { %v3125_v40 = vmul.f32 %v3122_v18, %v3111_v32  ;;  %v3115_v41 = vpop.f32.mrb[27].mxu0 }
 0x442   :  { %v3126_v43 = vmul.f32 %v3122_v18, %v3113_v36  ;;  %3567 = vmatprep.mubr.bf16.mxu0 %v3136_v37  ;;  %v3203_v36 = vld [vmem:[%s5356_s13] sm:$0x3]  ;;  %s4987_s13 = smov [#allocation19]  }
 0x443   :  { %v5318_v33 = vadd.f32 %v3125_v40, %v3120_v8  ;;  %3568 = vmatmul.mubr.bf16.vlgmr.msra.gmra.mrb[28].mxu0 %v3135_v2  ;;  %v4684_v8 = vld [vmem:[#allocation15 + $0x1c4] ss:$8 sps:$4 sm:$0xff]   ;;  %v3208_v37 = vrot.slane %v3203_v36, %v5228_v60  ;;  %v3855_v2 = vstv %s3897_s9  ;;  %s3880_s28 = sshll.u32 %s4987_s13, 4  ;;  %s3881_s28 = int_to_ptr.vmem [resolvable:$true] %s3880_s28 }
 0x444   :  { %v3130_v35 = vadd.f32 %v3126_v43, %v3121_v42  ;;  %3577 = vmatpush1.bf16.msra.mxu0 %v4625_v38  ;;  %v3212_v38 = vrot.slane %v3203_v36, %v5235_v62  ;;  %s4931_s29 = scalar_lea.vmem %s3881_s28, 64  ;;  %p4936_p8 = scmp.lt.s32.totalorder %s3881_s28, %s3881_s28 }
 0x445   :  { %3578 = vmatprep.subr.bf16.mxu0 %v4630_v11  ;;  %v3133_v18 = vmax.f32 %v5318_v33, 0.0  ;;  %v3852_v11 = vstv %s3898_s27  ;;  %p4932_p7 = scmp.ne.s32.totalorder %s3881_s28, %s4931_s29  ;;  %p4937_p9 = scmp.lt.s32.totalorder %s4931_s29, %s4931_s29 }
 0x446   :  { %v3134_v46 = vmax.f32 %v3130_v35, 0.0 }
 0x447   :  { %v3137_v19 = vpack.c.bf16 %v3133_v18, %v3133_v18  ;;  %p4938_p10 = por %p4937_p9, %p4936_p8 }
 0x448   :  { %3579 = vmatpush1.bf16.msra.mxu0 %v4628_v44  ;;  %v3138_v48 = vpack.c.bf16 %v3134_v46, %v3134_v46 }
 0x449   :  { %3580 = vmatprep.subr.bf16.mxu0 %v4633_v45  ;;  %p4939_p11 = pnand %p4938_p10, %p4932_p7 }
 0x44a   :  { %3608 = vmatprep.mubr.bf16.mxu0 %v3138_v48 }
 0x44c   :  { %3581 = vmatpush1.bf16.msra.mxu0 %v4631_v47 }
 0x44d   :  { %3582 = vmatprep.subr.bf16.mxu0 %v4636_v49 }
 0x450   :  { %3583 = vmatpush1.bf16.msra.mxu0 %v4634_v50 }
 0x451   :  { %3584 = vmatprep.subr.bf16.mxu0 %v4639_v51 }
 0x454   :  { %3585 = vmatpush1.bf16.msra.mxu0 %v4637_v52 }
 0x455   :  { %3586 = vmatprep.subr.bf16.mxu0 %v4642_v12 }
 0x458   :  { %3587 = vmatpush1.bf16.msra.mxu0 %v4640_v53 }
 0x459   :  { %3588 = vmatprep.subr.bf16.mxu0 %v4648_v56 }
 0x45c   :  { %3589 = vmatpush1.bf16.msra.mxu0 %v4646_v0 }
 0x45d   :  { %3590 = vmatprep.subr.bf16.mxu0 %v4654_v58 }
 0x460   :  { %3591 = vmatpush1.bf16.msra.mxu0 %v4652_v59 }
 0x461   :  { %3592 = vmatprep.subr.bf16.mxu0 %v4660_v61 }
 0x464   :  { %3593 = vmatpush1.bf16.msra.mxu0 %v4658_v63 }
 0x465   :  { %3594 = vmatprep.subr.bf16.mxu0 %v4666_v1 }
 0x468   :  { %3595 = vmatpush1.bf16.msra.mxu0 %v4664_v3 }
 0x469   :  { %3596 = vmatprep.subr.bf16.mxu0 %v4672_v4 }
 0x46c   :  { %3597 = vmatpush1.bf16.msra.mxu0 %v4670_v5 }
 0x46d   :  { %3598 = vmatprep.subr.bf16.mxu0 %v4678_v6 }
 0x470   :  { %3599 = vmatpush1.bf16.msra.mxu0 %v4676_v7 }
 0x471   :  { %3600 = vmatprep.subr.bf16.mxu0 %v4684_v8 }
 0x474   :  { %3601 = vmatpush1.bf16.msra.mxu0 %v4682_v9 }
 0x475   :  { %3602 = vmatprep.subr.bf16.mxu0 %v4690_v10 }
 0x478   :  { %3603 = vmatpush1.bf16.msra.mxu0 %v4688_v13 }
 0x479   :  { %3604 = vmatprep.subr.bf16.mxu0 %v4696_v14 }
 0x47c   :  { %3605 = vmatpush1.bf16.msra.mxu0 %v4694_v15 }
 0x47d   :  { %3606 = vmatprep.subr.bf16.mxu0 %v4702_v16 }
 0x480   :  { %3607 = vmatpush1.bf16.msra.mxu0 %v4700_v17 }
 0x483   :  { %3609 = vmatmul.mubr.bf16.vlgmr.msra.gmra.mrb[28].mxu0 %v3137_v19 }
 0x48f   :  { %v2951_v55 = vpop.f32.mrb[16].mxu1 }
 0x490   :  { %v4380_v57 = vadd.f32 %v2951_v55, %v2549_v20  ;;  %v2953_v23 = vpop.f32.mrb[17].mxu1 }
 0x491   :  { %v4381_v25 = vadd.f32 %v2953_v23, %v2553_v54  ;;  %v2955_v27 = vpop.f32.mrb[18].mxu1 }
 0x492   :  { %v2958_v28 = vmax.f32 %v4380_v57, 0.0  ;;  %v2956_v29 = vpop.f32.mrb[19].mxu1 }
 0x493   :  { %v2959_v30 = vmax.f32 %v4381_v25, 0.0 }
 0x494   :  { %v3617_v22 = vpack.c.bf16 %v2958_v28, %v2958_v28 }
 0x495   :  { %v3618_v21 = vpack.c.bf16 %v2959_v30, %v2959_v30 }
 0x497   :  { %3843 = vmatprep.mubr.bf16.mxu1 %v3618_v21 }
 0x498   :  { %3844 = vmatmul.mubr.bf16.vlgmr.msra.gmra.mrb[20].mxu1 %v3617_v22 }
 0x556   :  { %v3610_v24 = vpop.f32.mrb[28].mxu0 }
 0x557   :  { %v3612_v31 = vpop.f32.mrb[29].mxu0  ;;  %v4382_v39 = vadd.f32 %v3610_v24, %v3208_v37 }
 0x558   :  { %v3614_v32 = vpop.f32.mrb[30].mxu0  ;;  %v4383_v40 = vadd.f32 %v3612_v31, %v3212_v38 }
 0x559   :  { %v3615_v34 = vpop.f32.mrb[31].mxu0  ;;  %v3856_v42 = vmul.f32 %v4382_v39, %v3855_v2 }
 0x55a   :  { %v3857_v35 = vmul.f32 %v4383_v40, %v3855_v2 }
 0x56b   :  { %v3845_v41 = vpop.f32.mrb[20].mxu1 }
 0x56c   :  { %v3853_v43 = vmul.f32 %v3852_v11, %v3845_v41  ;;  %v3847_v33 = vpop.f32.mrb[21].mxu1 }
 0x56d   :  { %v3854_v44 = vmul.f32 %v3852_v11, %v3847_v33  ;;  %v3849_v45 = vpop.f32.mrb[22].mxu1 }
 0x56e   :  { %v3858_v46 = vadd.f32 %v3856_v42, %v3853_v43  ;;  %v3850_v47 = vpop.f32.mrb[23].mxu1 }
 0x56f   :  { %v3859_v48 = vadd.f32 %v3857_v35, %v3854_v44 }
 0x570   :  { %v3860_v49 = vmax.f32 %v3858_v46, 0.0 }
 0x571   :  { %v3861_v60 = vmax.f32 %v3859_v48, 0.0 }
 0x573   :  { %v3864_v50 = vcombine.low %v3860_v49, %v3861_v60 }
 0x575   :  { %4357 = vst.sshfl [vmem:[#allocation19] sm:$0x33 pattern:$0x76325410] %v3864_v50 }
 0x576   :  { %4942 = shalt.err (!%p4939_p11)
}
 0x577   :  { %s4943_s8 = scalar_lea.hbm %s5359_s16, 64 }
 0x578   :  { %p4944_p12 = scmp.ne.s32.totalorder %s5359_s16, %s4943_s8  ;;  %p4947_p13 = scmp.lt.u32.totalorder %s4943_s8, %s5359_s16 }
 0x57a   :  { %p4949_p0 = pnand %p4947_p13, %p4944_p12 }
 0x57c   :  { %4952 = shalt.err (!%p4949_p0)
}
 0x57d   :  { %3883 = dma.vmem_to_hbm [thread:$0]  %s3881_s28, 64, %s5359_s16, [#allocation4]  }
 0x57e   :  { %4965 = dma.done.wait [#allocation4], 64  }
 0x57f   :  { %4966 = vsyncadd [#allocation4], 4294967232 }
 0x580   :  { %3887 = vsyncpa [#allocation3], 1 }
 0x581   :  { %3888 = vsyncpa [#allocation7], 1 }
 0x582   :  { %3889 = vsyncpa [#allocation10], 1 }
 0x583   :  { %3890 = vsyncpa [#allocation13], 1 }
 0x584   :  { %3891 = vsyncpa [#allocation16], 1 }
 0x585   :  { %3892 = vsyncpa [#allocation4], 1 }
 0x586   :  { %3893 = vsyncpa [#allocation5], 1 }

</bundles_post_ra>
